<compile_context>
chip_gen: v5e
topology: v5e:2x2
jax: 0.10.0
libtpu: 0.0.40
codegen_flags: <defaults>
</compile_context>

<pallas_src>
import jax
import jax.numpy as jnp
from jax.experimental import pallas as pl
from jax.experimental.pallas import tpu as pltpu


def _round_up(x, m):
    return (x + m - 1) // m * m


# ----------------------------------------------------------------------------
# Pallas kernel: one LSTM layer, both directions, streamed over time chunks.
#
# refs per grid step (d = direction, c = time chunk):
#   lens_ref  : (Bp, 1)      int32  sequence lengths (0 for padded batch rows)
#   x_ref     : (Tc*Bp, Din) f32    input chunk (time-major 2-D slab)
#   wih_ref   : (Din, 4Hp)   bf16   this direction's W_ih^T (gates lane-aligned)
#   whh_ref   : (Hp, 4Hp)    bf16   this direction's W_hh^T
#   b_ref     : (1, 4Hp)     f32    b_ih + b_hh
#   out_ref   : (Tc*Bp, Hp)  f32    this direction's half of the layer output
#   hlast_ref : (Bp, Hp)     f32    this direction's half of the final hidden
#   scratch   : h, c (Bp,Hp) f32 ; xproj (Tc*Bp, 4Hp) f32
# ----------------------------------------------------------------------------
def bilstm_layer_kernel(lens_ref, x_ref, wih_ref, whh_ref, b_ref,
                        out_ref, hlast_ref, h_scr, c_scr, xproj_scr):
    d = pl.program_id(0)                     # 0 = forward, 1 = backward
    c = pl.program_id(1)                     # time-chunk grid index
    nc = pl.num_programs(1)
    Bp, Hp = h_scr.shape
    Tc = x_ref.shape[0] // Bp

    # Reset the recurrent state at the first chunk of each direction.
    @pl.when(c == 0)
    def _():
        h_scr[...] = jnp.zeros_like(h_scr)
        c_scr[...] = jnp.zeros_like(c_scr)

    # Hoisted input projection: one MXU-friendly GEMM per chunk.
    xproj_scr[...] = jnp.dot(x_ref[...].astype(wih_ref.dtype), wih_ref[...],
                             preferred_element_type=jnp.float32) + b_ref[...]

    # Global time offset of this chunk (fwd: ascending, bwd: descending).
    chunk = (1 - d) * c + d * (nc - 1 - c)
    t_base = chunk * Tc
    # Lengths broadcast to full lane width once (hoisted out of the loop).
    lens = jnp.broadcast_to(lens_ref[...], (Bp, Hp))

    def step(s, carry):
        h_prev, c_prev = carry
        # In-chunk time index (reversed for the backward direction).
        t_loc = (1 - d) * s + d * (Tc - 1 - s)
        row = pl.multiple_of(t_loc * Bp, Bp)
        gates = xproj_scr[pl.ds(row, Bp), :] + jnp.dot(
            h_prev.astype(whh_ref.dtype), whh_ref[...],
            preferred_element_type=jnp.float32)                 # (Bp, 4Hp)
        i = jax.nn.sigmoid(gates[:, 0 * Hp:1 * Hp])             # lane-aligned gates
        f = jax.nn.sigmoid(gates[:, 1 * Hp:2 * Hp])
        g = jnp.tanh(gates[:, 2 * Hp:3 * Hp])
        o = jax.nn.sigmoid(gates[:, 3 * Hp:4 * Hp])
        c_new = f * c_prev + i * g
        h_new = o * jnp.tanh(c_new)
        valid = (t_base + t_loc) < lens                         # (Bp, Hp) bool
        # Zero padded output slots (pad_packed_sequence) and freeze h/c past len.
        out_ref[pl.ds(row, Bp), :] = jnp.where(valid, h_new, 0.0).astype(out_ref.dtype)
        return jnp.where(valid, h_new, h_prev), jnp.where(valid, c_new, c_prev)

    h_fin, c_fin = jax.lax.fori_loop(0, Tc, step, (h_scr[...], c_scr[...]),
                                     unroll=True)
    h_scr[...] = h_fin
    c_scr[...] = c_fin
    hlast_ref[...] = h_fin   # block resident across chunks; final value == h_n


def bilstm_layer(x2d, lens, w_ih_t, w_hh_t, b, *, T, Bp, Hp, t_chunk):
    Din = x2d.shape[1]
    NT = T // t_chunk
    TBc = t_chunk * Bp

    def chunk_idx(d, c):                     # fwd: ascending, bwd: descending
        return (1 - d) * c + d * (NT - 1 - c)

    return pl.pallas_call(
        bilstm_layer_kernel,
        grid_spec=pltpu.PrefetchScalarGridSpec(
            num_scalar_prefetch=0,
            grid=(2, NT),
            in_specs=[
                pl.BlockSpec((Bp, 1), lambda d, c: (0, 0)),                 # lengths
                pl.BlockSpec((TBc, Din), lambda d, c: (chunk_idx(d, c), 0)),  # x chunk
                pl.BlockSpec((None, Din, 4 * Hp), lambda d, c: (d, 0, 0)),  # W_ih^T
                pl.BlockSpec((None, Hp, 4 * Hp), lambda d, c: (d, 0, 0)),   # W_hh^T
                pl.BlockSpec((None, 1, 4 * Hp), lambda d, c: (d, 0, 0)),    # bias
            ],
            out_specs=[
                pl.BlockSpec((TBc, Hp), lambda d, c: (chunk_idx(d, c), d)),  # out half
                pl.BlockSpec((Bp, Hp), lambda d, c: (0, d)),                 # h_n half
            ],
            scratch_shapes=[
                pltpu.VMEM((Bp, Hp), jnp.float32),          # h
                pltpu.VMEM((Bp, Hp), jnp.float32),          # c
                pltpu.VMEM((TBc, 4 * Hp), jnp.float32),     # hoisted x @ W_ih
            ],
        ),
        out_shape=(jax.ShapeDtypeStruct((T * Bp, 2 * Hp), jnp.float32),
                   jax.ShapeDtypeStruct((Bp, 2 * Hp), jnp.float32)),
        compiler_params=pltpu.CompilerParams(
            dimension_semantics=("parallel", "arbitrary"),
            vmem_limit_bytes=32 * 1024 * 1024),
    )(lens, x2d, w_ih_t, w_hh_t, b)


# ----------------------------------------------------------------------------
# Final fully-connected layer: (Bp, 2Hp) @ (2Hp, Op) + b, lane-dense output.
# ----------------------------------------------------------------------------
def fc_kernel(h_ref, w_ref, b_ref, out_ref):
    out_ref[...] = (jnp.dot(h_ref[...].astype(w_ref.dtype), w_ref[...],
                            preferred_element_type=jnp.float32)
                    + b_ref[...]).astype(out_ref.dtype)


def fc_layer(h, w_t, b):
    Bp = h.shape[0]
    Op = w_t.shape[1]
    return pl.pallas_call(
        fc_kernel,
        out_shape=jax.ShapeDtypeStruct((Bp, Op), jnp.float32),
        in_specs=[pl.BlockSpec(memory_space=pltpu.MemorySpace.VMEM)] * 3,
        out_specs=pl.BlockSpec(memory_space=pltpu.MemorySpace.VMEM),
    )(h, w_t, b)


# ----------------------------------------------------------------------------
# Parameters: PyTorch-layout weights, padded so each gate / each direction
# occupies its own 128-lane-aligned block (padding rows/cols are zero, which
# keeps the padded lanes exactly zero through the recurrence).
# ----------------------------------------------------------------------------
def init_params(key, vocab_size, embedding_dim, hidden_dim, output_dim,
                n_layers, pad_idx):
    H, E, O = hidden_dim, embedding_dim, output_dim
    Hp = _round_up(H, 128)
    Ep = _round_up(E, 128)
    Op = _round_up(O, 128)

    params = {"H_pad": Hp, "E_pad": Ep, "O_pad": Op,
              "pad_idx": pad_idx, "output_dim": O}

    k_emb, k_lstm, k_fc = jax.random.split(key, 3)

    emb = 0.1 * jax.random.normal(k_emb, (vocab_size, E), jnp.float32)
    emb = emb.at[pad_idx].set(0.0)                       # padding_idx row is zero
    params["embedding"] = jnp.zeros((vocab_size, Ep), jnp.float32).at[:, :E].set(emb)

    def pad_gate_rows(w):                                # (4H, C) -> (4Hp, C)
        out = jnp.zeros((4 * Hp, w.shape[1]), w.dtype)
        for g in range(4):
            out = out.at[g * Hp: g * Hp + H].set(w[g * H: (g + 1) * H])
        return out

    def pad_cols(w, col_map, Cp):                        # col_map: [(src, n, dst)]
        out = jnp.zeros((w.shape[0], Cp), w.dtype)
        for s, n, dst in col_map:
            out = out.at[:, dst: dst + n].set(w[:, s: s + n])
        return out

    layer_keys = jax.random.split(k_lstm, n_layers * 2)
    lstm = []
    for layer in range(n_layers):
        d_in = E if layer == 0 else 2 * H
        in_map = [(0, E, 0)] if layer == 0 else [(0, H, 0), (H, H, Hp)]
        d_in_pad = Ep if layer == 0 else 2 * Hp
        wih_l, whh_l, b_l = [], [], []
        for d in range(2):                               # 0 = forward, 1 = backward
            kk = jax.random.split(layer_keys[layer * 2 + d], 4)
            w_ih = 0.1 * jax.random.normal(kk[0], (4 * H, d_in), jnp.float32)
            w_hh = 0.1 * jax.random.normal(kk[1], (4 * H, H), jnp.float32)
            b_ih = 0.1 * jax.random.normal(kk[2], (4 * H,), jnp.float32)
            b_hh = 0.1 * jax.random.normal(kk[3], (4 * H,), jnp.float32)
            wih_l.append(pad_cols(pad_gate_rows(w_ih), in_map, d_in_pad).T)     # (Din_p,4Hp)
            whh_l.append(pad_cols(pad_gate_rows(w_hh), [(0, H, 0)], Hp).T)      # (Hp,4Hp)
            b_l.append(pad_gate_rows((b_ih + b_hh).reshape(4 * H, 1)).reshape(1, 4 * Hp))
        lstm.append({
            "w_ih_t": jnp.stack(wih_l).astype(jnp.bfloat16),   # (2, Din_p, 4Hp)
            "w_hh_t": jnp.stack(whh_l).astype(jnp.bfloat16),   # (2, Hp, 4Hp)
            "b": jnp.stack(b_l),                               # (2, 1, 4Hp) f32
        })
    params["lstm"] = lstm

    kk = jax.random.split(k_fc, 2)
    w_fc = 0.1 * jax.random.normal(kk[0], (O, 2 * H), jnp.float32)
    b_fc = 0.1 * jax.random.normal(kk[1], (O,), jnp.float32)
    w_fc_p = pad_cols(w_fc, [(0, H, 0), (H, H, Hp)], 2 * Hp)           # (O, 2Hp)
    w_fc_p = jnp.zeros((Op, 2 * Hp), jnp.float32).at[:O].set(w_fc_p)   # (Op, 2Hp)
    params["fc_w_t"] = w_fc_p.T.astype(jnp.bfloat16)                   # (2Hp, Op)
    params["fc_b"] = jnp.zeros((1, Op), jnp.float32).at[0, :O].set(b_fc)
    return params


def rnn_forward(params, text, text_lengths, *, t_chunk):
    # text: (T, B) int32 ; text_lengths: (B,) int32
    T, B = text.shape
    assert T % t_chunk == 0
    Bp = _round_up(max(B, 8), 8)
    Hp = params["H_pad"]

    # Pad batch to a sublane multiple; padded rows get length 0 (always masked).
    text_p = jnp.full((T, Bp), params["pad_idx"], jnp.int32).at[:, :B].set(text)
    lens_p = jnp.zeros((Bp, 1), jnp.int32).at[:B, 0].set(text_lengths)

    # Embedding lookup (gather glue); dropout == identity in eval mode.
    emb = jnp.take(params["embedding"], text_p, axis=0)        # (T, Bp, Ep) f32
    x = emb.reshape(T * Bp, -1)                                # contiguous 2-D slab

    h_last = None
    for lp in params["lstm"]:
        x, h_last = bilstm_layer(x, lens_p, lp["w_ih_t"], lp["w_hh_t"], lp["b"],
                                 T=T, Bp=Bp, Hp=Hp, t_chunk=t_chunk)
        # inter-layer dropout == identity in eval mode.

    # hidden = dropout(cat(h_n fwd, h_n bwd)) -> identity dropout; h_last already
    # holds the two direction halves in its 128-lane blocks, matching fc_w_t.
    logits_p = fc_layer(h_last, params["fc_w_t"], params["fc_b"])
    return logits_p[:B, :params["output_dim"]]


if __name__ == "__main__":
    VOCAB, EMB, HID, OUT = 50, 32, 32, 1
    N_LAYERS, PAD_IDX = 2, 0
    T, B = 8, 4
    T_CHUNK = 4

    key = jax.random.PRNGKey(0)
    k_param, k_text = jax.random.split(key)

    params = init_params(k_param, VOCAB, EMB, HID, OUT, N_LAYERS, PAD_IDX)

    text_lengths = jnp.array([8, 5, 3, 6], dtype=jnp.int32)    # (B,)
    tokens = jax.random.randint(k_text, (T, B), 1, VOCAB, dtype=jnp.int32)
    pad_mask = jnp.arange(T)[:, None] < text_lengths[None, :]
    text = jnp.where(pad_mask, tokens, PAD_IDX).astype(jnp.int32)   # (T, B)

    logits = rnn_forward(params, text, text_lengths, t_chunk=T_CHUNK)
    jax.block_until_ready(logits)
    assert logits.shape == (B, OUT) and logits.dtype == jnp.float32
    print("KERNEL_OK")
</pallas_src>

<mosaic_0001>
module attributes {stable_mosaic.version = 11 : i64} {
  func.func @bilstm_layer_kernel(%arg0: i32, %arg1: i32, %arg2: memref<8x1xi32, #tpu.memory_space<vmem>>, %arg3: memref<32x128xf32, #tpu.memory_space<vmem>>, %arg4: memref<1x128x512xbf16, #tpu.memory_space<vmem>>, %arg5: memref<1x128x512xbf16, #tpu.memory_space<vmem>>, %arg6: memref<1x1x512xf32, #tpu.memory_space<vmem>>, %arg7: memref<32x128xf32, #tpu.memory_space<vmem>>, %arg8: memref<8x128xf32, #tpu.memory_space<vmem>>, %arg9: memref<8x128xf32, #tpu.memory_space<vmem>>, %arg10: memref<8x128xf32, #tpu.memory_space<vmem>>, %arg11: memref<32x512xf32, #tpu.memory_space<vmem>>) attributes {dimension_semantics = [#tpu.dimension_semantics<parallel>, #tpu.dimension_semantics<arbitrary>], iteration_bounds = array<i64: 2, 2>, scalar_prefetch = 0 : i64, scratch_operands = 3 : i64, tpu.core_type = #tpu.core_type<tc>, window_params = [{pipeline_mode = #tpu.pipeline_mode<synchronous>, transform_indices = @transform_0, window_bounds = array<i64: 8, 1>}, {transform_indices = @transform_1, window_bounds = array<i64: 32, 128>}, {transform_indices = @transform_2, window_bounds = array<i64: 1, 128, 512>}, {transform_indices = @transform_3, window_bounds = array<i64: 1, 128, 512>}, {transform_indices = @transform_4, window_bounds = array<i64: 1, 1, 512>}, {transform_indices = @transform_5, window_bounds = array<i64: 32, 128>}, {transform_indices = @transform_6, window_bounds = array<i64: 8, 128>}]} {
    %c0_i32 = arith.constant 0 : i32
    %0 = arith.cmpi eq, %arg1, %c0_i32 : i32
    %1 = arith.extui %0 : i1 to i32
    %c0_i32_0 = arith.constant 0 : i32
    %2 = arith.cmpi ne, %1, %c0_i32_0 : i32
    scf.if %2 {
      %cst_77 = arith.constant 0.000000e+00 : f32
      %219 = vector.broadcast %cst_77 : f32 to vector<8x128xf32>
      %c0_78 = arith.constant 0 : index
      %c0_79 = arith.constant 0 : index
      %220 = vector.load %arg9[%c0_78, %c0_79] : memref<8x128xf32, #tpu.memory_space<vmem>>, vector<8x128xf32>
      tpu.vector_store %arg9[%c0_78, %c0_79], %219 {strides = array<i32>} : memref<8x128xf32, #tpu.memory_space<vmem>>, vector<8x128xf32>,
      %cst_80 = arith.constant 0.000000e+00 : f32
      %221 = vector.broadcast %cst_80 : f32 to vector<8x128xf32>
      %c0_81 = arith.constant 0 : index
      %c0_82 = arith.constant 0 : index
      %222 = vector.load %arg10[%c0_81, %c0_82] : memref<8x128xf32, #tpu.memory_space<vmem>>, vector<8x128xf32>
      tpu.vector_store %arg10[%c0_81, %c0_82], %221 {strides = array<i32>} : memref<8x128xf32, #tpu.memory_space<vmem>>, vector<8x128xf32>,
    } else {
    }
    %c0 = arith.constant 0 : index
    %c0_1 = arith.constant 0 : index
    %3 = vector.load %arg3[%c0, %c0_1] : memref<32x128xf32, #tpu.memory_space<vmem>>, vector<32x128xf32>
    %4 = arith.truncf %3 : vector<32x128xf32> to vector<32x128xbf16>
    %c0_2 = arith.constant 0 : index
    %c0_3 = arith.constant 0 : index
    %c0_4 = arith.constant 0 : index
    %5 = vector.load %arg4[%c0_2, %c0_3, %c0_4] : memref<1x128x512xbf16, #tpu.memory_space<vmem>>, vector<1x128x512xbf16>
    %6 = vector.shape_cast %5 : vector<1x128x512xbf16> to vector<128x512xbf16>
    %cst = arith.constant dense<0.000000e+00> : vector<32x512xf32>
    %7 = tpu.matmul %4, %6, %cst {dimension_numbers = #tpu.dot_dimension_numbers<[1], [0], [0], [1], [0, 0, 1, 1], [], []>} : vector<32x128xbf16>, vector<128x512xbf16>, vector<32x512xf32> -> vector<32x512xf32>
    %c0_5 = arith.constant 0 : index
    %c0_6 = arith.constant 0 : index
    %c0_7 = arith.constant 0 : index
    %8 = vector.load %arg6[%c0_5, %c0_6, %c0_7] : memref<1x1x512xf32, #tpu.memory_space<vmem>>, vector<1x1x512xf32>
    %9 = vector.shape_cast %8 : vector<1x1x512xf32> to vector<1x512xf32>
    %10 = vector.broadcast %9 : vector<1x512xf32> to vector<32x512xf32>
    %11 = arith.addf %7, %10 : vector<32x512xf32>
    %c0_8 = arith.constant 0 : index
    %c0_9 = arith.constant 0 : index
    %12 = vector.load %arg11[%c0_8, %c0_9] : memref<32x512xf32, #tpu.memory_space<vmem>>, vector<32x512xf32>
    tpu.vector_store %arg11[%c0_8, %c0_9], %11 {strides = array<i32>} : memref<32x512xf32, #tpu.memory_space<vmem>>, vector<32x512xf32>,
    %c1_i32 = arith.constant 1 : i32
    %13 = arith.subi %c1_i32, %arg0 : i32
    %14 = arith.muli %13, %arg1 : i32
    %c1_i32_10 = arith.constant 1 : i32
    %15 = arith.subi %c1_i32_10, %arg1 : i32
    %16 = arith.muli %arg0, %15 : i32
    %17 = arith.addi %14, %16 : i32
    %c4_i32 = arith.constant 4 : i32
    %18 = arith.muli %17, %c4_i32 : i32
    %c0_11 = arith.constant 0 : index
    %c0_12 = arith.constant 0 : index
    %19 = vector.load %arg2[%c0_11, %c0_12] : memref<8x1xi32, #tpu.memory_space<vmem>>, vector<8x1xi32>
    %20 = vector.shape_cast %19 : vector<8x1xi32> to vector<8x1xi32>
    %21 = vector.broadcast %20 : vector<8x1xi32> to vector<8x128xi32>
    %c0_13 = arith.constant 0 : index
    %c0_14 = arith.constant 0 : index
    %22 = vector.load %arg9[%c0_13, %c0_14] : memref<8x128xf32, #tpu.memory_space<vmem>>, vector<8x128xf32>
    %c0_15 = arith.constant 0 : index
    %c0_16 = arith.constant 0 : index
    %23 = vector.load %arg10[%c0_15, %c0_16] : memref<8x128xf32, #tpu.memory_space<vmem>>, vector<8x128xf32>
    %c0_i32_17 = arith.constant 0 : i32
    %c1_i32_18 = arith.constant 1 : i32
    %24 = arith.subi %c1_i32_18, %arg0 : i32
    %25 = arith.muli %24, %c0_i32_17 : i32
    %c3_i32 = arith.constant 3 : i32
    %26 = arith.subi %c3_i32, %c0_i32_17 : i32
    %27 = arith.muli %arg0, %26 : i32
    %28 = arith.addi %25, %27 : i32
    %c8_i32 = arith.constant 8 : i32
    %29 = arith.muli %28, %c8_i32 : i32
    %30 = tpu.assume_multiple %29, 8 : i32
    %31 = arith.index_cast %30 : i32 to index
    %c0_19 = arith.constant 0 : index
    %32 = vector.load %arg11[%31, %c0_19] : memref<32x512xf32, #tpu.memory_space<vmem>>, vector<8x512xf32>
    %33 = arith.truncf %22 : vector<8x128xf32> to vector<8x128xbf16>
    %c0_20 = arith.constant 0 : index
    %c0_21 = arith.constant 0 : index
    %c0_22 = arith.constant 0 : index
    %34 = vector.load %arg5[%c0_20, %c0_21, %c0_22] : memref<1x128x512xbf16, #tpu.memory_space<vmem>>, vector<1x128x512xbf16>
    %35 = vector.shape_cast %34 : vector<1x128x512xbf16> to vector<128x512xbf16>
    %cst_23 = arith.constant dense<0.000000e+00> : vector<8x512xf32>
    %36 = tpu.matmul %33, %35, %cst_23 {dimension_numbers = #tpu.dot_dimension_numbers<[1], [0], [0], [1], [0, 0, 1, 1], [], []>} : vector<8x128xbf16>, vector<128x512xbf16>, vector<8x512xf32> -> vector<8x512xf32>
    %37 = arith.addf %32, %36 : vector<8x512xf32>
    %38 = vector.extract_strided_slice %37 {offsets = [0, 0], sizes = [8, 128], strides = [1, 1]} : vector<8x512xf32> to vector<8x128xf32>
    %39 = arith.negf %38 : vector<8x128xf32>
    %40 = math.exp %39 : vector<8x128xf32>
    %cst_24 = arith.constant 1.000000e+00 : f32
    %41 = vector.broadcast %cst_24 : f32 to vector<8x128xf32>
    %42 = arith.addf %41, %40 : vector<8x128xf32>
    %43 = arith.divf %41, %42 : vector<8x128xf32>
    %44 = vector.extract_strided_slice %37 {offsets = [0, 128], sizes = [8, 128], strides = [1, 1]} : vector<8x512xf32> to vector<8x128xf32>
    %45 = arith.negf %44 : vector<8x128xf32>
    %46 = math.exp %45 : vector<8x128xf32>
    %cst_25 = arith.constant 1.000000e+00 : f32
    %47 = vector.broadcast %cst_25 : f32 to vector<8x128xf32>
    %48 = arith.addf %47, %46 : vector<8x128xf32>
    %49 = arith.divf %47, %48 : vector<8x128xf32>
    %50 = vector.extract_strided_slice %37 {offsets = [0, 256], sizes = [8, 128], strides = [1, 1]} : vector<8x512xf32> to vector<8x128xf32>
    %51 = math.tanh %50 : vector<8x128xf32>
    %52 = vector.extract_strided_slice %37 {offsets = [0, 384], sizes = [8, 128], strides = [1, 1]} : vector<8x512xf32> to vector<8x128xf32>
    %53 = arith.negf %52 : vector<8x128xf32>
    %54 = math.exp %53 : vector<8x128xf32>
    %cst_26 = arith.constant 1.000000e+00 : f32
    %55 = vector.broadcast %cst_26 : f32 to vector<8x128xf32>
    %56 = arith.addf %55, %54 : vector<8x128xf32>
    %57 = arith.divf %55, %56 : vector<8x128xf32>
    %58 = arith.mulf %49, %23 : vector<8x128xf32>
    %59 = arith.mulf %43, %51 : vector<8x128xf32>
    %60 = arith.addf %58, %59 : vector<8x128xf32>
    %61 = math.tanh %60 : vector<8x128xf32>
    %62 = arith.mulf %57, %61 : vector<8x128xf32>
    %63 = arith.addi %18, %28 : i32
    %64 = vector.broadcast %63 : i32 to vector<8x128xi32>
    %65 = arith.cmpi slt, %64, %21 : vector<8x128xi32>
    %cst_27 = arith.constant 0.000000e+00 : f32
    %66 = vector.broadcast %cst_27 : f32 to vector<8x128xf32>
    %67 = arith.select %65, %62, %66 : vector<8x128xi1>, vector<8x128xf32>
    %68 = arith.index_cast %30 : i32 to index
    %c0_28 = arith.constant 0 : index
    %69 = vector.load %arg7[%68, %c0_28] : memref<32x128xf32, #tpu.memory_space<vmem>>, vector<8x128xf32>
    tpu.vector_store %arg7[%68, %c0_28], %67 {strides = array<i32>} : memref<32x128xf32, #tpu.memory_space<vmem>>, vector<8x128xf32>,
    %70 = arith.select %65, %62, %22 : vector<8x128xi1>, vector<8x128xf32>
    %71 = arith.select %65, %60, %23 : vector<8x128xi1>, vector<8x128xf32>
    %c1_i32_29 = arith.constant 1 : i32
    %c1_i32_30 = arith.constant 1 : i32
    %72 = arith.subi %c1_i32_30, %arg0 : i32
    %73 = arith.muli %72, %c1_i32_29 : i32
    %c3_i32_31 = arith.constant 3 : i32
    %74 = arith.subi %c3_i32_31, %c1_i32_29 : i32
    %75 = arith.muli %arg0, %74 : i32
    %76 = arith.addi %73, %75 : i32
    %c8_i32_32 = arith.constant 8 : i32
    %77 = arith.muli %76, %c8_i32_32 : i32
    %78 = tpu.assume_multiple %77, 8 : i32
    %79 = arith.index_cast %78 : i32 to index
    %c0_33 = arith.constant 0 : index
    %80 = vector.load %arg11[%79, %c0_33] : memref<32x512xf32, #tpu.memory_space<vmem>>, vector<8x512xf32>
    %81 = arith.truncf %70 : vector<8x128xf32> to vector<8x128xbf16>
    %c0_34 = arith.constant 0 : index
    %c0_35 = arith.constant 0 : index
    %c0_36 = arith.constant 0 : index
    %82 = vector.load %arg5[%c0_34, %c0_35, %c0_36] : memref<1x128x512xbf16, #tpu.memory_space<vmem>>, vector<1x128x512xbf16>
    %83 = vector.shape_cast %82 : vector<1x128x512xbf16> to vector<128x512xbf16>
    %cst_37 = arith.constant dense<0.000000e+00> : vector<8x512xf32>
    %84 = tpu.matmul %81, %83, %cst_37 {dimension_numbers = #tpu.dot_dimension_numbers<[1], [0], [0], [1], [0, 0, 1, 1], [], []>} : vector<8x128xbf16>, vector<128x512xbf16>, vector<8x512xf32> -> vector<8x512xf32>
    %85 = arith.addf %80, %84 : vector<8x512xf32>
    %86 = vector.extract_strided_slice %85 {offsets = [0, 0], sizes = [8, 128], strides = [1, 1]} : vector<8x512xf32> to vector<8x128xf32>
    %87 = arith.negf %86 : vector<8x128xf32>
    %88 = math.exp %87 : vector<8x128xf32>
    %cst_38 = arith.constant 1.000000e+00 : f32
    %89 = vector.broadcast %cst_38 : f32 to vector<8x128xf32>
    %90 = arith.addf %89, %88 : vector<8x128xf32>
    %91 = arith.divf %89, %90 : vector<8x128xf32>
    %92 = vector.extract_strided_slice %85 {offsets = [0, 128], sizes = [8, 128], strides = [1, 1]} : vector<8x512xf32> to vector<8x128xf32>
    %93 = arith.negf %92 : vector<8x128xf32>
    %94 = math.exp %93 : vector<8x128xf32>
    %cst_39 = arith.constant 1.000000e+00 : f32
    %95 = vector.broadcast %cst_39 : f32 to vector<8x128xf32>
    %96 = arith.addf %95, %94 : vector<8x128xf32>
    %97 = arith.divf %95, %96 : vector<8x128xf32>
    %98 = vector.extract_strided_slice %85 {offsets = [0, 256], sizes = [8, 128], strides = [1, 1]} : vector<8x512xf32> to vector<8x128xf32>
    %99 = math.tanh %98 : vector<8x128xf32>
    %100 = vector.extract_strided_slice %85 {offsets = [0, 384], sizes = [8, 128], strides = [1, 1]} : vector<8x512xf32> to vector<8x128xf32>
    %101 = arith.negf %100 : vector<8x128xf32>
    %102 = math.exp %101 : vector<8x128xf32>
    %cst_40 = arith.constant 1.000000e+00 : f32
    %103 = vector.broadcast %cst_40 : f32 to vector<8x128xf32>
    %104 = arith.addf %103, %102 : vector<8x128xf32>
    %105 = arith.divf %103, %104 : vector<8x128xf32>
    %106 = arith.mulf %97, %71 : vector<8x128xf32>
    %107 = arith.mulf %91, %99 : vector<8x128xf32>
    %108 = arith.addf %106, %107 : vector<8x128xf32>
    %109 = math.tanh %108 : vector<8x128xf32>
    %110 = arith.mulf %105, %109 : vector<8x128xf32>
    %111 = arith.addi %18, %76 : i32
    %112 = vector.broadcast %111 : i32 to vector<8x128xi32>
    %113 = arith.cmpi slt, %112, %21 : vector<8x128xi32>
    %cst_41 = arith.constant 0.000000e+00 : f32
    %114 = vector.broadcast %cst_41 : f32 to vector<8x128xf32>
    %115 = arith.select %113, %110, %114 : vector<8x128xi1>, vector<8x128xf32>
    %116 = arith.index_cast %78 : i32 to index
    %c0_42 = arith.constant 0 : index
    %117 = vector.load %arg7[%116, %c0_42] : memref<32x128xf32, #tpu.memory_space<vmem>>, vector<8x128xf32>
    tpu.vector_store %arg7[%116, %c0_42], %115 {strides = array<i32>} : memref<32x128xf32, #tpu.memory_space<vmem>>, vector<8x128xf32>,
    %118 = arith.select %113, %110, %70 : vector<8x128xi1>, vector<8x128xf32>
    %119 = arith.select %113, %108, %71 : vector<8x128xi1>, vector<8x128xf32>
    %c2_i32 = arith.constant 2 : i32
    %c1_i32_43 = arith.constant 1 : i32
    %120 = arith.subi %c1_i32_43, %arg0 : i32
    %121 = arith.muli %120, %c2_i32 : i32
    %c3_i32_44 = arith.constant 3 : i32
    %122 = arith.subi %c3_i32_44, %c2_i32 : i32
    %123 = arith.muli %arg0, %122 : i32
    %124 = arith.addi %121, %123 : i32
    %c8_i32_45 = arith.constant 8 : i32
    %125 = arith.muli %124, %c8_i32_45 : i32
    %126 = tpu.assume_multiple %125, 8 : i32
    %127 = arith.index_cast %126 : i32 to index
    %c0_46 = arith.constant 0 : index
    %128 = vector.load %arg11[%127, %c0_46] : memref<32x512xf32, #tpu.memory_space<vmem>>, vector<8x512xf32>
    %129 = arith.truncf %118 : vector<8x128xf32> to vector<8x128xbf16>
    %c0_47 = arith.constant 0 : index
    %c0_48 = arith.constant 0 : index
    %c0_49 = arith.constant 0 : index
    %130 = vector.load %arg5[%c0_47, %c0_48, %c0_49] : memref<1x128x512xbf16, #tpu.memory_space<vmem>>, vector<1x128x512xbf16>
    %131 = vector.shape_cast %130 : vector<1x128x512xbf16> to vector<128x512xbf16>
    %cst_50 = arith.constant dense<0.000000e+00> : vector<8x512xf32>
    %132 = tpu.matmul %129, %131, %cst_50 {dimension_numbers = #tpu.dot_dimension_numbers<[1], [0], [0], [1], [0, 0, 1, 1], [], []>} : vector<8x128xbf16>, vector<128x512xbf16>, vector<8x512xf32> -> vector<8x512xf32>
    %133 = arith.addf %128, %132 : vector<8x512xf32>
    %134 = vector.extract_strided_slice %133 {offsets = [0, 0], sizes = [8, 128], strides = [1, 1]} : vector<8x512xf32> to vector<8x128xf32>
    %135 = arith.negf %134 : vector<8x128xf32>
    %136 = math.exp %135 : vector<8x128xf32>
    %cst_51 = arith.constant 1.000000e+00 : f32
    %137 = vector.broadcast %cst_51 : f32 to vector<8x128xf32>
    %138 = arith.addf %137, %136 : vector<8x128xf32>
    %139 = arith.divf %137, %138 : vector<8x128xf32>
    %140 = vector.extract_strided_slice %133 {offsets = [0, 128], sizes = [8, 128], strides = [1, 1]} : vector<8x512xf32> to vector<8x128xf32>
    %141 = arith.negf %140 : vector<8x128xf32>
    %142 = math.exp %141 : vector<8x128xf32>
    %cst_52 = arith.constant 1.000000e+00 : f32
    %143 = vector.broadcast %cst_52 : f32 to vector<8x128xf32>
    %144 = arith.addf %143, %142 : vector<8x128xf32>
    %145 = arith.divf %143, %144 : vector<8x128xf32>
    %146 = vector.extract_strided_slice %133 {offsets = [0, 256], sizes = [8, 128], strides = [1, 1]} : vector<8x512xf32> to vector<8x128xf32>
    %147 = math.tanh %146 : vector<8x128xf32>
    %148 = vector.extract_strided_slice %133 {offsets = [0, 384], sizes = [8, 128], strides = [1, 1]} : vector<8x512xf32> to vector<8x128xf32>
    %149 = arith.negf %148 : vector<8x128xf32>
    %150 = math.exp %149 : vector<8x128xf32>
    %cst_53 = arith.constant 1.000000e+00 : f32
    %151 = vector.broadcast %cst_53 : f32 to vector<8x128xf32>
    %152 = arith.addf %151, %150 : vector<8x128xf32>
    %153 = arith.divf %151, %152 : vector<8x128xf32>
    %154 = arith.mulf %145, %119 : vector<8x128xf32>
    %155 = arith.mulf %139, %147 : vector<8x128xf32>
    %156 = arith.addf %154, %155 : vector<8x128xf32>
    %157 = math.tanh %156 : vector<8x128xf32>
    %158 = arith.mulf %153, %157 : vector<8x128xf32>
    %159 = arith.addi %18, %124 : i32
    %160 = vector.broadcast %159 : i32 to vector<8x128xi32>
    %161 = arith.cmpi slt, %160, %21 : vector<8x128xi32>
    %cst_54 = arith.constant 0.000000e+00 : f32
    %162 = vector.broadcast %cst_54 : f32 to vector<8x128xf32>
    %163 = arith.select %161, %158, %162 : vector<8x128xi1>, vector<8x128xf32>
    %164 = arith.index_cast %126 : i32 to index
    %c0_55 = arith.constant 0 : index
    %165 = vector.load %arg7[%164, %c0_55] : memref<32x128xf32, #tpu.memory_space<vmem>>, vector<8x128xf32>
    tpu.vector_store %arg7[%164, %c0_55], %163 {strides = array<i32>} : memref<32x128xf32, #tpu.memory_space<vmem>>, vector<8x128xf32>,
    %166 = arith.select %161, %158, %118 : vector<8x128xi1>, vector<8x128xf32>
    %167 = arith.select %161, %156, %119 : vector<8x128xi1>, vector<8x128xf32>
    %c3_i32_56 = arith.constant 3 : i32
    %c1_i32_57 = arith.constant 1 : i32
    %168 = arith.subi %c1_i32_57, %arg0 : i32
    %169 = arith.muli %168, %c3_i32_56 : i32
    %c3_i32_58 = arith.constant 3 : i32
    %170 = arith.subi %c3_i32_58, %c3_i32_56 : i32
    %171 = arith.muli %arg0, %170 : i32
    %172 = arith.addi %169, %171 : i32
    %c8_i32_59 = arith.constant 8 : i32
    %173 = arith.muli %172, %c8_i32_59 : i32
    %174 = tpu.assume_multiple %173, 8 : i32
    %175 = arith.index_cast %174 : i32 to index
    %c0_60 = arith.constant 0 : index
    %176 = vector.load %arg11[%175, %c0_60] : memref<32x512xf32, #tpu.memory_space<vmem>>, vector<8x512xf32>
    %177 = arith.truncf %166 : vector<8x128xf32> to vector<8x128xbf16>
    %c0_61 = arith.constant 0 : index
    %c0_62 = arith.constant 0 : index
    %c0_63 = arith.constant 0 : index
    %178 = vector.load %arg5[%c0_61, %c0_62, %c0_63] : memref<1x128x512xbf16, #tpu.memory_space<vmem>>, vector<1x128x512xbf16>
    %179 = vector.shape_cast %178 : vector<1x128x512xbf16> to vector<128x512xbf16>
    %cst_64 = arith.constant dense<0.000000e+00> : vector<8x512xf32>
    %180 = tpu.matmul %177, %179, %cst_64 {dimension_numbers = #tpu.dot_dimension_numbers<[1], [0], [0], [1], [0, 0, 1, 1], [], []>} : vector<8x128xbf16>, vector<128x512xbf16>, vector<8x512xf32> -> vector<8x512xf32>
    %181 = arith.addf %176, %180 : vector<8x512xf32>
    %182 = vector.extract_strided_slice %181 {offsets = [0, 0], sizes = [8, 128], strides = [1, 1]} : vector<8x512xf32> to vector<8x128xf32>
    %183 = arith.negf %182 : vector<8x128xf32>
    %184 = math.exp %183 : vector<8x128xf32>
    %cst_65 = arith.constant 1.000000e+00 : f32
    %185 = vector.broadcast %cst_65 : f32 to vector<8x128xf32>
    %186 = arith.addf %185, %184 : vector<8x128xf32>
    %187 = arith.divf %185, %186 : vector<8x128xf32>
    %188 = vector.extract_strided_slice %181 {offsets = [0, 128], sizes = [8, 128], strides = [1, 1]} : vector<8x512xf32> to vector<8x128xf32>
    %189 = arith.negf %188 : vector<8x128xf32>
    %190 = math.exp %189 : vector<8x128xf32>
    %cst_66 = arith.constant 1.000000e+00 : f32
    %191 = vector.broadcast %cst_66 : f32 to vector<8x128xf32>
    %192 = arith.addf %191, %190 : vector<8x128xf32>
    %193 = arith.divf %191, %192 : vector<8x128xf32>
    %194 = vector.extract_strided_slice %181 {offsets = [0, 256], sizes = [8, 128], strides = [1, 1]} : vector<8x512xf32> to vector<8x128xf32>
    %195 = math.tanh %194 : vector<8x128xf32>
    %196 = vector.extract_strided_slice %181 {offsets = [0, 384], sizes = [8, 128], strides = [1, 1]} : vector<8x512xf32> to vector<8x128xf32>
    %197 = arith.negf %196 : vector<8x128xf32>
    %198 = math.exp %197 : vector<8x128xf32>
    %cst_67 = arith.constant 1.000000e+00 : f32
    %199 = vector.broadcast %cst_67 : f32 to vector<8x128xf32>
    %200 = arith.addf %199, %198 : vector<8x128xf32>
    %201 = arith.divf %199, %200 : vector<8x128xf32>
    %202 = arith.mulf %193, %167 : vector<8x128xf32>
    %203 = arith.mulf %187, %195 : vector<8x128xf32>
    %204 = arith.addf %202, %203 : vector<8x128xf32>
    %205 = math.tanh %204 : vector<8x128xf32>
    %206 = arith.mulf %201, %205 : vector<8x128xf32>
    %207 = arith.addi %18, %172 : i32
    %208 = vector.broadcast %207 : i32 to vector<8x128xi32>
    %209 = arith.cmpi slt, %208, %21 : vector<8x128xi32>
    %cst_68 = arith.constant 0.000000e+00 : f32
    %210 = vector.broadcast %cst_68 : f32 to vector<8x128xf32>
    %211 = arith.select %209, %206, %210 : vector<8x128xi1>, vector<8x128xf32>
    %212 = arith.index_cast %174 : i32 to index
    %c0_69 = arith.constant 0 : index
    %213 = vector.load %arg7[%212, %c0_69] : memref<32x128xf32, #tpu.memory_space<vmem>>, vector<8x128xf32>
    tpu.vector_store %arg7[%212, %c0_69], %211 {strides = array<i32>} : memref<32x128xf32, #tpu.memory_space<vmem>>, vector<8x128xf32>,
    %214 = arith.select %209, %206, %166 : vector<8x128xi1>, vector<8x128xf32>
    %215 = arith.select %209, %204, %167 : vector<8x128xi1>, vector<8x128xf32>
    %c4_i32_70 = arith.constant 4 : i32
    %c0_71 = arith.constant 0 : index
    %c0_72 = arith.constant 0 : index
    %216 = vector.load %arg9[%c0_71, %c0_72] : memref<8x128xf32, #tpu.memory_space<vmem>>, vector<8x128xf32>
    tpu.vector_store %arg9[%c0_71, %c0_72], %214 {strides = array<i32>} : memref<8x128xf32, #tpu.memory_space<vmem>>, vector<8x128xf32>,
    %c0_73 = arith.constant 0 : index
    %c0_74 = arith.constant 0 : index
    %217 = vector.load %arg10[%c0_73, %c0_74] : memref<8x128xf32, #tpu.memory_space<vmem>>, vector<8x128xf32>
    tpu.vector_store %arg10[%c0_73, %c0_74], %215 {strides = array<i32>} : memref<8x128xf32, #tpu.memory_space<vmem>>, vector<8x128xf32>,
    %c0_75 = arith.constant 0 : index
    %c0_76 = arith.constant 0 : index
    %218 = vector.load %arg8[%c0_75, %c0_76] : memref<8x128xf32, #tpu.memory_space<vmem>>, vector<8x128xf32>
    tpu.vector_store %arg8[%c0_75, %c0_76], %214 {strides = array<i32>} : memref<8x128xf32, #tpu.memory_space<vmem>>, vector<8x128xf32>,
    return
  }
  func.func @transform_0(%arg0: i32, %arg1: i32) -> (i32, i32) {
    %c0_i32 = arith.constant 0 : i32
    %c0_i32_0 = arith.constant 0 : i32
    %c0_i32_1 = arith.constant 0 : i32
    return %c0_i32, %c0_i32_0 : i32, i32
  }
  func.func @transform_1(%arg0: i32, %arg1: i32) -> (i32, i32) {
    %c1_i32 = arith.constant 1 : i32
    %0 = arith.subi %c1_i32, %arg0 : i32
    %1 = arith.muli %0, %arg1 : i32
    %c1_i32_0 = arith.constant 1 : i32
    %2 = arith.subi %c1_i32_0, %arg1 : i32
    %3 = arith.muli %arg0, %2 : i32
    %4 = arith.addi %1, %3 : i32
    %c0_i32 = arith.constant 0 : i32
    %c0_i32_1 = arith.constant 0 : i32
    return %4, %c0_i32 : i32, i32
  }
  func.func @transform_2(%arg0: i32, %arg1: i32) -> (i32, i32, i32) {
    %c0_i32 = arith.constant 0 : i32
    %c0_i32_0 = arith.constant 0 : i32
    %c0_i32_1 = arith.constant 0 : i32
    return %arg0, %c0_i32, %c0_i32_0 : i32, i32, i32
  }
  func.func @transform_3(%arg0: i32, %arg1: i32) -> (i32, i32, i32) {
    %c0_i32 = arith.constant 0 : i32
    %c0_i32_0 = arith.constant 0 : i32
    %c0_i32_1 = arith.constant 0 : i32
    return %arg0, %c0_i32, %c0_i32_0 : i32, i32, i32
  }
  func.func @transform_4(%arg0: i32, %arg1: i32) -> (i32, i32, i32) {
    %c0_i32 = arith.constant 0 : i32
    %c0_i32_0 = arith.constant 0 : i32
    %c0_i32_1 = arith.constant 0 : i32
    return %arg0, %c0_i32, %c0_i32_0 : i32, i32, i32
  }
  func.func @transform_5(%arg0: i32, %arg1: i32) -> (i32, i32) {
    %c1_i32 = arith.constant 1 : i32
    %0 = arith.subi %c1_i32, %arg0 : i32
    %1 = arith.muli %0, %arg1 : i32
    %c1_i32_0 = arith.constant 1 : i32
    %2 = arith.subi %c1_i32_0, %arg1 : i32
    %3 = arith.muli %arg0, %2 : i32
    %4 = arith.addi %1, %3 : i32
    %c0_i32 = arith.constant 0 : i32
    return %4, %arg0 : i32, i32
  }
  func.func @transform_6(%arg0: i32, %arg1: i32) -> (i32, i32) {
    %c0_i32 = arith.constant 0 : i32
    %c0_i32_0 = arith.constant 0 : i32
    return %c0_i32, %arg0 : i32, i32
  }
}

</mosaic_0001>

<bundles_post_ra>
// kernel: tpu_custom_call.1
= control target key start
LH: loop header
LB: loop body
LE: loop exit
PB: predicated region body
PF: predicated region fallthrough
CT: control target
= control target key end

     0   :  { %s4641_s0 = inlined_call_operand.vmem [shape: s32[8,1], index: 0, kind: input, shape index: {}]   ;;  %s4642_s1 = inlined_call_operand.hbm [shape: f32[64,128], index: 1, kind: input, shape index: {}]   ;;  %s4643_s2 = inlined_call_operand.hbm [shape: bf16[2,128,512], index: 2, kind: input, shape index: {}]   ;;  %s4644_s3 = inlined_call_operand.hbm [shape: bf16[2,128,512], index: 3, kind: input, shape index: {}]   ;;  %s4645_s4 = inlined_call_operand.vmem [shape: f32[2,1,512], index: 4, kind: input, shape index: {}]   ;;  %s4646_s5 = inlined_call_operand.hbm [shape: f32[64,256], index: 5, kind: output, shape index: {0}]   ;;  %s4647_s6 = inlined_call_operand.hbm [shape: f32[8,256], index: 6, kind: output, shape index: {1}]  }
   0x1   :  { %4672 = sst [smem:[#allocation32_spill]] %s4641_s0 }
   0x2   :  { %4673 = sst [smem:[#allocation33_spill]] %s4642_s1 }
   0x3   :  { %4674 = sst [smem:[#allocation34_spill]] %s4643_s2 }
   0x4   :  { %4675 = sst [smem:[#allocation35_spill]] %s4644_s3 }
   0x5   :  { %4676 = sst [smem:[#allocation36_spill]] %s4645_s4 }
   0x6   :  { %4677 = sst [smem:[#allocation37_spill]] %s4646_s5 }
   0x7   :  { %4678 = sst [smem:[#allocation38_spill]] %s4647_s6 }
   0x8   :  { %12 = vsyncpa [#allocation6], 0 }
   0x9   :  { %14 = vsyncpa [#allocation6 + $0x1], 0 }
   0xa   :  { %15 = vsyncpa [#allocation9], 0 }
   0xb   :  { %17 = vsyncpa [#allocation9 + $0x1], 0 }
   0xc   :  { %18 = vsyncpa [#allocation7], 0 }
   0xd   :  { %20 = vsyncpa [#allocation7 + $0x1], 0 }
   0xe   :  { %21 = vsyncpa [#allocation13], 0 }
   0xf   :  { %23 = vsyncpa [#allocation13 + $0x1], 0  ;;  %s3712_s21 = smov 0   ;;  %s3714_s22 = smov 0  }
  0x10   :  { %s3716_s23 = smov 0   ;;  %s3718_s24 = smov 0  }
  0x11   :  { %s3720_s25 = smov 0   ;;  %s3722_s26 = smov 0  }
  0x12   :  { %s3724_s27 = smov 0   ;;  %s3726_s28 = smov 0  }
  0x13   :  { %s3728_s29 = smov 0   ;;  %s3730_s30 = smov 0  }
  0x14   :  { %s3732_s7 = smov 0   ;;  %s3734_s8 = smov 0  }
  0x15   :  { %s3736_s9 = smov 0   ;;  %s3738_s10 = smov 0  }
  0x16 LB: > { %4679 = sst [smem:[#allocation18_spill]] %s3626_s24  ;;  %s3783_s11 = sadd.s32 4294967295, %s3666_s10   ;;  %s3666_s10 = sphi %s3738_s10, %s29_s10   ;;  %s3662_s9 = sphi %s3736_s9, %s4743_s9   ;;  %s3658_s8 = sphi %s3734_s8, %s4754_s8   ;;  %s3654_s7 = sphi %s3732_s7, %s4753_s7   ;;  %s3650_s30 = sphi %s3730_s30, %s4740_s30   ;;  %s3646_s29 = sphi %s3728_s29, %s4752_s29   ;;  %s3642_s28 = sphi %s3726_s28, %s4751_s28   ;;  %s3638_s27 = sphi %s3724_s27, %s4750_s27   ;;  %s3634_s26 = sphi %s3722_s26, %s4749_s26   ;;  %s3630_s25 = sphi %s3720_s25, %s4748_s25   ;;  %s3626_s24 = sphi %s3718_s24, %s4738_s24   ;;  %s3622_s23 = sphi %s3716_s23, %s4747_s23   ;;  %s3618_s22 = sphi %s3714_s22, %s4746_s22   ;;  %s3614_s21 = sphi %s3712_s21, %s4745_s21  }
  0x17   : > { %4680 = sst [smem:[#allocation19_spill]] %s3630_s25  ;;  %s2318_s12 = sadd.s32 4294967294, %s3666_s10  }
  0x18   : > { %4681 = sst [smem:[#allocation20_spill]] %s3650_s30  ;;  %p87_p0 = scmp.eq.s32.totalorder %s3666_s10, 0 }
  0x19   : > { %4682 = sst [smem:[#allocation21_spill]] %s3654_s7  ;;  %p93_p1 = scmp.eq.s32.totalorder %s3783_s11, 0 }
  0x1a   : > { %4683 = sst [smem:[#allocation22_spill]] %s3658_s8  ;;  %p112_p2 = scmp.ne.s32.totalorder %s3634_s26, %s3630_s25 }
  0x1b   : > { %4684 = sst [smem:[#allocation23_spill]] %s3662_s9  ;;  %p118_p3 = scmp.ne.s32.totalorder %s3630_s25, %s3626_s24 }
  0x1c   : > { %p4666_p4 = scmp.eq.s32.totalorder %s3783_s11, 3  ;;  %p3796_p5 = por %p112_p2, %p87_p0 }
  0x1d   : > { %p3800_p6 = scmp.eq.s32.totalorder %s2318_s12, 3  ;;  %p3806_p7 = por %p118_p3, %p93_p1 }
  0x1e   : > { %p3812_p8 = por %p4666_p4, %p112_p2  ;;  %p4665_p10 = scmp.lt.s32.totalorder %s3666_s10, 4 }
  0x1f   : > { %s4687_s16 = scalar_select %p3806_p7, 1, 0 }
  0x20   : > { %s4689_s17 = scalar_select %p3812_p8, 1, 0 }
  0x21   : > { %4688 = sst [smem:[#allocation24_spill]] %s4687_s16  ;;  %p3818_p9 = por %p3800_p6, %p118_p3 }
  0x22   : > { %4690 = sst [smem:[#allocation25_spill]] %s4689_s17  ;;  %s288_s19 = sand.u32 1, %s3666_s10  }
  0x23   : > { %s4691_s18 = scalar_select %p3818_p9, 1, 0 }
  0x24   : > { %s290_s20 = sand.u32 1, %s3634_s26   ;;  %s3012_s13 = sshll.u32 %s3662_s9, 8 }
  0x25   : > { %4692 = sst [smem:[#allocation26_spill]] %s4691_s18  ;;  %s2324_s12 = sshll.u32 %s290_s20, 8 }
  0x26   : > { %s4693_s2 = sld [smem:[#allocation34_spill]]  ;;  %s292_s30 = scalar_lea.vmem [#allocation8], %s2324_s12 }
  0x27   : > { %s300_s4 = sshll.u32 %s292_s30, 4  ;;  %p3833_p11 = pnand %p4665_p10, %p3796_p5  ;;  %s301_s4 = int_to_ptr.vmem [resolvable:$true] %s300_s4 }
  0x28   : > { %s4695_s3 = sld [smem:[#allocation35_spill]]  ;;  %s4655_s24 = smov 256  }
  0x29   : > { %s4656_s30 = smov 16   ;;  %p2330_p12 = scmp.ge.s32.totalorder %s3666_s10, 1 }
  0x2a   : > { %p337_p13 = scmp.lt.s32.totalorder %s3666_s10, 5  ;;  %s195_s7 = sadd.s32 1, %s3622_s23 }
  0x2b   : > { %p205_p4 = scmp.ne.s32.totalorder %s3622_s23, %s3618_s22  ;;  %p211_p9 = scmp.ne.s32.totalorder %s3618_s22, %s3614_s21 }
  0x2c   : > { %s297_s5 = scalar_lea.hbm %s4693_s2, %s3012_s13  ;;  %s314_s2 = scalar_lea.vmem [#allocation10], %s2324_s12 }
  0x2d   : > { %s298_s0 = sshll.u32 %s297_s5, 4  ;;  %s3840_s5 = scalar_lea.sflag [#allocation9], %s288_s19  ;;  %s299_s0 = int_to_ptr.hbm [resolvable:$true] %s298_s0 }
  0x2e   : > { %s319_s6 = scalar_lea.hbm %s4695_s3, %s3012_s13  ;;  %s3848_s17 = sshll.u32 %s314_s2, 4 }
  0x2f   : > { %3195 = dma.hbm_to_vmem [thread:$0]  (!%p3833_p11), %s299_s0, 4096, %s301_s4, %s3840_s5, %s4655_s24, %s4655_s24, %s4656_s30  }
  0x30   : > { %s320_s14 = sshll.u32 %s319_s6, 4  ;;  %4696 = sst [smem:[#allocation27_spill]] %s3848_s17  ;;  %s3850_s14 = int_to_ptr.hbm [resolvable:$true] %s320_s14 }
  0x31   : > { %p3855_p2 = pnand %p2330_p12, %p337_p13  ;;  %s38_s0 = sadd.s32 1, %s3658_s8 }
  0x32   : > { %p39_p3 = scmp.ge.s32.totalorder %s38_s0, 2  ;;  %s41_s4 = sadd.s32 1, %s3662_s9 }
  0x33   : > { %s4697_s13 = scalar_select %p3855_p2, 1, 0 }
  0x34   : > { %s66_s2 = ssub.s32 1, %s3662_s9  ;;  %s68_s19 = ssub.s32 1, %s3658_s8 }
  0x35   : > { %4698 = sst [smem:[#allocation28_spill]] %s4697_s13  ;;  %s4756_s0 = smov (%p39_p3, %s38_s0), 0 }
  0x36   : > { %4699 = sst [smem:[#allocation29_spill]] %s4756_s0  ;;  %s4758_s4 = smov (!%p39_p3, %s41_s4), %s3662_s9 }
  0x37   : > { %s67_s12 = smul.u32 %s3658_s8, %s66_s2  ;;  %s73_s20 = ssub.s32 1, %s4756_s0 }
  0x38   : > { %p43_p5 = scmp.ge.s32.totalorder %s4758_s4, 2  ;;  %s69_s6 = smul.u32 %s3662_s9, %s68_s19 }
  0x39   : > { %s79_s24 = sadd.s32 1, %s3646_s29  ;;  %p86_p12 = scmp.ne.s32.totalorder %s3646_s29, %s3642_s28 }
  0x3a   : > { %s4760_s4 = smov (%p43_p5, %s4758_s4), 0  ;;  %s70_s30 = sadd.s32 %s69_s6, %s67_s12 }
  0x3b   : > { %4700 = sst [smem:[#allocation30_spill]] %s4760_s4  ;;  %p3876_p13 = por %p87_p0, %p86_p12 }
  0x3c   : > { %s71_s2 = ssub.s32 1, %s4760_s4  ;;  %s74_s19 = smul.u32 %s73_s20, %s4760_s4 }
  0x3d   : > { %s72_s3 = smul.u32 %s71_s2, %s4756_s0  ;;  %p92_p3 = scmp.ne.s32.totalorder %s3642_s28, %s3638_s27 }
  0x3e   : > { %s102_s8 = ssub.s32 %s3662_s9, %s4760_s4  ;;  %s4703_s13 = sadd.s32 1, %s3634_s26 }
  0x3f   : > { %s75_s12 = sadd.s32 %s74_s19, %s72_s3  ;;  %p3890_p0 = por %p93_p1, %p92_p3 }
  0x40   : > { %s76_s16 = ssub.s32 %s70_s30, %s75_s12  ;;  %p103_p5 = scmp.eq.s32.totalorder %s102_s8, 0 }
  0x41   : > { %p77_p12 = scmp.eq.s32.totalorder %s76_s16, 0  ;;  %s192_s25 = sor.u32 %s102_s8, %s76_s16 }
  0x42   : > { %s3897_s20 = scalar_select %p103_p5, %s3634_s26, %s4703_s13  }
  0x43   : > { %s3900_s2 = scalar_select %p77_p12, %s3646_s29, %s79_s24  }
  0x44   : > { %p193_p10 = scmp.eq.s32.totalorder %s192_s25, 0  ;;  %s261_s3 = sand.u32 1, %s3646_s29  }
  0x45   : > { %4704 = sst [smem:[#allocation31_spill]] %s3900_s2  ;;  %p4705_p1 = scmp.eq.s32.totalorder %s3783_s11, 3 }
  0x46   : > { %s3908_s27 = scalar_select %p193_p10, %s3622_s23, %s195_s7  }
  0x47   : > { %p3912_p3 = por %p4705_p1, %p205_p4  ;;  %p3918_p8 = por %p3800_p6, %p211_p9 }
  0x48   : > { %s2321_s16 = sshll.u32 %s261_s3, 5  ;;  %s3011_s24 = sshll.u32 %s70_s30, 5 }
  0x49   : > { %s4707_s8 = scalar_select %p3918_p8, 1, 0 }
  0x4a   : > { %s4708_s1 = sld [smem:[#allocation33_spill]]  ;;  %s265_s4 = scalar_lea.vmem [#allocation5], %s2321_s16 }
  0x4b   : > { %s278_s0 = sshll.u32 %s265_s4, 4  ;;  %p4709_p4 = scmp.lt.s32.totalorder %s3666_s10, 4  ;;  %s279_s0 = int_to_ptr.vmem [resolvable:$true] %s278_s0 }
  0x4c   : > { %s262_s15 = scalar_lea.sflag [#allocation6], %s261_s3 }
  0x4d   : > { %p3929_p10 = pnand %p4709_p4, %p3876_p13 }
  0x4f   : > { %p3428_p9 = pneg %p3929_p10 }
  0x50   : > { %s275_s25 = scalar_lea.hbm %s4708_s1, %s3011_s24  ;;  %s3431_s24 = scalar_lea.hbm %s4708_s1, 64 }
  0x51   : > { %s276_s7 = sshll.u32 %s275_s25, 4  ;;  %s277_s7 = int_to_ptr.hbm [resolvable:$true] %s276_s7 }
  0x52   : > { %s3424_s2 = sshra.s32 %s277_s7, 4  ;;  %s3425_s2 = int_to_ptr.hbm [resolvable:$true] %s3424_s2 }
  0x53   : > { %s3426_s30 = scalar_lea.hbm %s3425_s2, 32 }
  0x54   : > { %p3427_p6 = scmp.ne.s32.totalorder %s3425_s2, %s3426_s30  ;;  %p3433_p1 = scmp.lt.s32.totalorder %s3431_s24, %s3426_s30 }
  0x56   : > { %p3429_p5 = pnand %p3428_p9, %p3427_p6 }
  0x58   : > { %p3430_p12 = pneg %p3429_p5 }
  0x5a   : > { %p3435_p8 = pnand %p3433_p1, %p3430_p12 }
  0x5c   : > { %3438 = shalt.err (!%p3435_p8)
}
  0x5d   : > { %s3670_s17 = smov 128   ;;  %s4711_s3 = sld [smem:[#allocation27_spill]] }
  0x5e   : > { %s3671_s13 = smov 8   ;;  %s4712_s2 = smov 16  }
  0x5f   : > { %3192 = dma.hbm_to_vmem [thread:$0]  (!%p3929_p10), %s277_s7, 512, %s279_s0, %s262_s15, %s3670_s17, %s3670_s17, %s3671_s13  }
  0x60   : > { %s4713_s12 = smov 256   ;;  %341 = sbr.rel (%p3855_p2) target bundleno = 917 (0x395), region = 40 }
  0x61   : > { %s343_s30 = sand.u32 (!%p3855_p2), 1, %s3642_s28  }
  0x62   : > { %s2331_s16 = sshll.u32 (!%p3855_p2), %s343_s30, 5  ;;  %s344_s24 = scalar_lea.sflag (!%p3855_p2), [#allocation6], %s343_s30 }
  0x63   : > { %s4714_s25 = int_to_ptr.vmem [resolvable:$true] %s4711_s3  ;;  %s3952_s1 = scalar_lea.vmem (!%p3855_p2), [#allocation5], %s2331_s16 }
  0x64   : > { %3198 = dma.hbm_to_vmem [thread:$0]  (!%p3833_p11), %s3850_s14, 4096, %s4714_s25, %s3840_s5, %s4713_s12, %s4713_s12, %s4712_s2  }
  0x65   : > { %3597 = dma.done.wait (%p3890_p0), %s344_s24, 512  }
  0x66   : > { %3599 = vsyncadd (%p3890_p0), %s344_s24, 4294966784  ;;  %s4716_s9 = sld [smem:[#allocation19_spill]]  ;;  %s353_s0 = sand.u32 1, %s3783_s11  }
  0x67   : > { %s354_s7 = scalar_lea.sflag [#allocation9], %s353_s0 }
  0x6c   : > { %s3960_s5 = sand.u32 1, %s4716_s9  }
  0x6d   : > { %s2332_s14 = sshll.u32 %s3960_s5, 8 }
  0x6e   : > { %s3963_s15 = scalar_lea.vmem [#allocation8], %s2332_s14 }
  0x6f   : > { %3601 = dma.done.wait (%p3806_p7), %s354_s7, 8192  }
  0x70   : > { %3603 = vsyncadd (%p3806_p7), %s354_s7, 4294959104  ;;  %s4718_s6 = sld [smem:[#allocation21_spill]]  ;;  %s406_s17 = sand.u32 1, %s3618_s22  }
  0x71   : > { %s2334_s11 = sshll.u32 %s406_s17, 5  ;;  %s2335_s3 = sshll.u32 %s3960_s5, 3 }
  0x72   : > { %s4719_s25 = sld [smem:[#allocation36_spill]]  ;;  %s3980_s30 = scalar_lea.vmem [#allocation10], %s2332_s14 }
  0x73   : > { %s3982_s16 = scalar_lea.vmem [#allocation11], %s2334_s11  ;;  %s3984_s24 = scalar_lea.vmem [#allocation12], %s2335_s3 }
  0x74   : > { %s4720_s9 = sld [smem:[#allocation20_spill]] }
  0x76   : > { %p422_p8 = scmp.lt.s32.totalorder %s4718_s6, 1 }
  0x78   : > { %s4762_s6 = smov (!%p422_p8, %s4718_s6), 1 }
  0x79   : > { %s2336_s13 = sshll.u32 %s4762_s6, 2 }
  0x7a   : > { %s3978_s4 = scalar_lea.vmem %s4719_s25, %s2336_s13  ;;  %p2337_p7 = scmp.ne.s32.totalorder %s4720_s9, 0 }
  0x7c   : > { %435 = sbr.rel (%p2337_p7) target bundleno = 132 (0x84), region = 56 }
  0x81   : > { %v3672_v0 = vmov 0.0  }
  0x82   : > { %436 = vst [vmem:[#allocation2] sm:$0xff] %v3672_v0 }
  0x83   : > { %437 = vst [vmem:[#allocation3] sm:$0xff] %v3672_v0 }
  0x84 PF: > { %v2452_v1 = vld [vmem:[%s3963_s15 + $0xe0] sm:$0xf]  ;;  %v3044_v2 = vld [vmem:[%s3963_s15 + $0xec] sm:$0xf0]  ;;  %v3042_v3 = vld [vmem:[%s3963_s15 + $0xe4] sm:$0xf] }
  0x85   : > { %v2453_v4 = vor.u32 %v3044_v2, %v2452_v1  ;;  %v2454_v5 = vld [vmem:[%s3963_s15 + $0xf0] sm:$0xf0]  ;;  %v2460_v6 = vld [vmem:[%s3963_s15 + $0xe8] sm:$0xf]  ;;  %v3045_v7 = vld [vmem:[%s3963_s15 + $0xf4] sm:$0xf0] }
  0x86   : > { %v2457_v8 = vor.u32 %v3042_v3, %v2454_v5  ;;  %v2461_v9 = vor.u32 %v3045_v7, %v2460_v6  ;;  %v3043_v10 = vld [vmem:[%s3963_s15 + $0xec] sm:$0xf]  ;;  %v2462_v11 = vld [vmem:[%s3963_s15 + $0xf8] sm:$0xf0]  ;;  %v2436_v12 = vld [vmem:[%s3963_s15 + $0xc0] sm:$0xf] }
  0x87   : > { %646 = vmatpush.bf16.msra.mxu0 %v2453_v4  ;;  %v2465_v13 = vor.u32 %v3043_v10, %v2462_v11  ;;  %v3040_v14 = vld [vmem:[%s3963_s15 + $0xcc] sm:$0xf0]  ;;  %v3038_v15 = vld [vmem:[%s3963_s15 + $0xc4] sm:$0xf]  ;;  %v2438_v16 = vld [vmem:[%s3963_s15 + $0xd0] sm:$0xf0] }
  0x88   : > { %665 = vmatpush.bf16.msra.mxu1 %v2457_v8  ;;  %684 = vmatpush.bf16.msra.mxu2 %v2461_v9  ;;  %v2437_v17 = vor.u32 %v3040_v14, %v2436_v12  ;;  %v2441_v18 = vor.u32 %v3038_v15, %v2438_v16  ;;  %v2444_v19 = vld [vmem:[%s3963_s15 + $0xc8] sm:$0xf]  ;;  %v3041_v20 = vld [vmem:[%s3963_s15 + $0xd4] sm:$0xf0]  ;;  %v3039_v21 = vld [vmem:[%s3963_s15 + $0xcc] sm:$0xf] }
  0x89   : > { %703 = vmatpush.bf16.msra.mxu3 %v2465_v13  ;;  %v2445_v22 = vor.u32 %v3041_v20, %v2444_v19  ;;  %v2446_v23 = vld [vmem:[%s3963_s15 + $0xd8] sm:$0xf0]  ;;  %v2420_v24 = vld [vmem:[%s3963_s15 + $0xa0] sm:$0xf]  ;;  %v3036_v25 = vld [vmem:[%s3963_s15 + $0xac] sm:$0xf0] }
  0x8a   : > { %v2449_v26 = vor.u32 %v3039_v21, %v2446_v23  ;;  %v3034_v27 = vld [vmem:[%s3963_s15 + $0xa4] sm:$0xf]  ;;  %v2422_v28 = vld [vmem:[%s3963_s15 + $0xb0] sm:$0xf0]  ;;  %v2428_v29 = vld [vmem:[%s3963_s15 + $0xa8] sm:$0xf]  ;;  %v2421_v30 = vor.u32 %v3036_v25, %v2420_v24 }
  0x8b   : > { %647 = vmatpush.bf16.msra.mxu0 %v2437_v17  ;;  %v3037_v31 = vld [vmem:[%s3963_s15 + $0xb4] sm:$0xf0]  ;;  %v3035_v32 = vld [vmem:[%s3963_s15 + $0xac] sm:$0xf]  ;;  %v2430_v33 = vld [vmem:[%s3963_s15 + $0xb8] sm:$0xf0]  ;;  %v2425_v34 = vor.u32 %v3034_v27, %v2422_v28 }
  0x8c   : > { %666 = vmatpush.bf16.msra.mxu1 %v2441_v18  ;;  %685 = vmatpush.bf16.msra.mxu2 %v2445_v22  ;;  %v2429_v35 = vor.u32 %v3037_v31, %v2428_v29  ;;  %v2404_v36 = vld [vmem:[%s3963_s15 + $0x80] sm:$0xf]  ;;  %v3032_v37 = vld [vmem:[%s3963_s15 + $0x8c] sm:$0xf0]  ;;  %v3030_v38 = vld [vmem:[%s3963_s15 + $0x84] sm:$0xf]  ;;  %v2433_v39 = vor.u32 %v3035_v32, %v2430_v33 }
  0x8d   : > { %704 = vmatpush.bf16.msra.mxu3 %v2449_v26  ;;  %v2406_v40 = vld [vmem:[%s3963_s15 + $0x90] sm:$0xf0]  ;;  %v2412_v41 = vld [vmem:[%s3963_s15 + $0x88] sm:$0xf]  ;;  %v3033_v42 = vld [vmem:[%s3963_s15 + $0x94] sm:$0xf0]  ;;  %v2405_v45 = vor.u32 %v3032_v37, %v2404_v36 }
  0x8e   : > { %v3031_v43 = vld [vmem:[%s3963_s15 + $0x8c] sm:$0xf]  ;;  %v2414_v44 = vld [vmem:[%s3963_s15 + $0x98] sm:$0xf0]  ;;  %v2409_v46 = vor.u32 %v3030_v38, %v2406_v40  ;;  %v2413_v47 = vor.u32 %v3033_v42, %v2412_v41  ;;  %v2388_v48 = vld [vmem:[%s3963_s15 + $0x60] sm:$0xf] }
  0x8f   : > { %648 = vmatpush.bf16.msra.mxu0 %v2421_v30  ;;  %v3028_v49 = vld [vmem:[%s3963_s15 + $0x6c] sm:$0xf0]  ;;  %v3026_v50 = vld [vmem:[%s3963_s15 + $0x64] sm:$0xf]  ;;  %v2417_v51 = vor.u32 %v3031_v43, %v2414_v44  ;;  %v2390_v52 = vld [vmem:[%s3963_s15 + $0x70] sm:$0xf0] }
  0x90   : > { %667 = vmatpush.bf16.msra.mxu1 %v2425_v34  ;;  %686 = vmatpush.bf16.msra.mxu2 %v2429_v35  ;;  %v2396_v53 = vld [vmem:[%s3963_s15 + $0x68] sm:$0xf]  ;;  %v3029_v54 = vld [vmem:[%s3963_s15 + $0x74] sm:$0xf0]  ;;  %v3027_v55 = vld [vmem:[%s3963_s15 + $0x6c] sm:$0xf]  ;;  %v2389_v57 = vor.u32 %v3028_v49, %v2388_v48  ;;  %v2393_v58 = vor.u32 %v3026_v50, %v2390_v52 }
  0x91   : > { %705 = vmatpush.bf16.msra.mxu3 %v2433_v39  ;;  %v2398_v56 = vld [vmem:[%s3963_s15 + $0x78] sm:$0xf0]  ;;  %v2397_v59 = vor.u32 %v3029_v54, %v2396_v53  ;;  %v2372_v60 = vld [vmem:[%s3963_s15 + $0x40] sm:$0xf]  ;;  %v3024_v61 = vld [vmem:[%s3963_s15 + $0x4c] sm:$0xf0] }
  0x92   : > { %v3022_v62 = vld [vmem:[%s3963_s15 + $0x44] sm:$0xf]  ;;  %v2401_v63 = vor.u32 %v3027_v55, %v2398_v56  ;;  %v2374_v0 = vld [vmem:[%s3963_s15 + $0x50] sm:$0xf0]  ;;  %v2380_v1 = vld [vmem:[%s3963_s15 + $0x48] sm:$0xf]  ;;  %v2373_v5 = vor.u32 %v3024_v61, %v2372_v60 }
  0x93   : > { %649 = vmatpush.bf16.msra.mxu0 %v2405_v45  ;;  %v3025_v2 = vld [vmem:[%s3963_s15 + $0x54] sm:$0xf0]  ;;  %v3023_v3 = vld [vmem:[%s3963_s15 + $0x4c] sm:$0xf]  ;;  %v2382_v4 = vld [vmem:[%s3963_s15 + $0x58] sm:$0xf0]  ;;  %v2377_v6 = vor.u32 %v3022_v62, %v2374_v0 }
  0x94   : > { %668 = vmatpush.bf16.msra.mxu1 %v2409_v46  ;;  %687 = vmatpush.bf16.msra.mxu2 %v2413_v47  ;;  %v2381_v7 = vor.u32 %v3025_v2, %v2380_v1  ;;  %v2356_v8 = vld [vmem:[%s3963_s15 + $0x20] sm:$0xf]  ;;  %v3020_v9 = vld [vmem:[%s3963_s15 + $0x2c] sm:$0xf0]  ;;  %v3018_v10 = vld [vmem:[%s3963_s15 + $0x24] sm:$0xf]  ;;  %v2385_v11 = vor.u32 %v3023_v3, %v2382_v4 }
  0x95   : > { %706 = vmatpush.bf16.msra.mxu3 %v2417_v51  ;;  %v2358_v12 = vld [vmem:[%s3963_s15 + $0x30] sm:$0xf0]  ;;  %v2364_v13 = vld [vmem:[%s3963_s15 + $0x28] sm:$0xf]  ;;  %v3021_v14 = vld [vmem:[%s3963_s15 + $0x34] sm:$0xf0]  ;;  %v2357_v17 = vor.u32 %v3020_v9, %v2356_v8 }
  0x96   : > { %v3019_v15 = vld [vmem:[%s3963_s15 + $0x2c] sm:$0xf]  ;;  %v2366_v16 = vld [vmem:[%s3963_s15 + $0x38] sm:$0xf0]  ;;  %v2340_v18 = vld [vmem:[%s3963_s15] sm:$0xf]  ;;  %v2361_v20 = vor.u32 %v3018_v10, %v2358_v12  ;;  %v2365_v21 = vor.u32 %v3021_v14, %v2364_v13 }
  0x97   : > { %650 = vmatpush.bf16.msra.mxu0 %v2389_v57  ;;  %v3016_v19 = vld [vmem:[%s3963_s15 + $0xc] sm:$0xf0]  ;;  %v3014_v22 = vld [vmem:[%s3963_s15 + $0x4] sm:$0xf]  ;;  %v2342_v23 = vld [vmem:[%s3963_s15 + $0x10] sm:$0xf0]  ;;  %v2369_v25 = vor.u32 %v3019_v15, %v2366_v16 }
  0x98   : > { %669 = vmatpush.bf16.msra.mxu1 %v2393_v58  ;;  %688 = vmatpush.bf16.msra.mxu2 %v2397_v59  ;;  %v2348_v24 = vld [vmem:[%s3963_s15 + $0x8] sm:$0xf]  ;;  %v3017_v26 = vld [vmem:[%s3963_s15 + $0x14] sm:$0xf0]  ;;  %v3015_v27 = vld [vmem:[%s3963_s15 + $0xc] sm:$0xf]  ;;  %v2341_v32 = vor.u32 %v3016_v19, %v2340_v18  ;;  %v2345_v36 = vor.u32 %v3014_v22, %v2342_v23 }
  0x99   : > { %707 = vmatpush.bf16.msra.mxu3 %v2401_v63  ;;  %v2350_v28 = vld [vmem:[%s3963_s15 + $0x18] sm:$0xf0]  ;;  %v438_v29 = vld [vmem:[%s3952_s1] sm:$0xff]  ;;  %v3077_v31 = vld [vmem:[%s3980_s30 + $0xec] sm:$0xf0]  ;;  %v2349_v37 = vor.u32 %v3017_v26, %v2348_v24  ;;  %s4721_s14 = sld [smem:[#allocation32_spill]] }
  0x9a   : > { %v2583_v30 = vld [vmem:[%s3980_s30 + $0xe0] sm:$0xf]  ;;  %v439_v33 = vld [vmem:[%s3952_s1 + $0x8] sm:$0xff]  ;;  %v3075_v34 = vld [vmem:[%s3980_s30 + $0xe4] sm:$0xf]  ;;  %v2353_v38 = vor.u32 %v3015_v27, %v2350_v28  ;;  %s4723_s7 = sld [smem:[#allocation21_spill]] }
  0x9b   : > { %651 = vmatpush.bf16.msra.mxu0 %v2373_v5  ;;  %v2585_v35 = vld [vmem:[%s3980_s30 + $0xf0] sm:$0xf0]  ;;  %v2584_v39 = vor.u32 %v3077_v31, %v2583_v30  ;;  %v2591_v40 = vld [vmem:[%s3980_s30 + $0xe8] sm:$0xf]  ;;  %v3078_v41 = vld [vmem:[%s3980_s30 + $0xf4] sm:$0xf0]  ;;  %v442_v43 = vpack.c.bf16 %v439_v33, %v438_v29 }
  0x9c   : > { %670 = vmatpush.bf16.msra.mxu1 %v2377_v6  ;;  %689 = vmatpush.bf16.msra.mxu2 %v2381_v7  ;;  %v3076_v42 = vld [vmem:[%s3980_s30 + $0xec] sm:$0xf]  ;;  %v2588_v44 = vor.u32 %v3075_v34, %v2585_v35  ;;  %v2593_v45 = vld [vmem:[%s3980_s30 + $0xf8] sm:$0xf0]  ;;  %v2567_v46 = vld [vmem:[%s3980_s30 + $0xc0] sm:$0xf]  ;;  %v2592_v50 = vor.u32 %v3078_v41, %v2591_v40 }
  0x9d   : > { %708 = vmatpush.bf16.msra.mxu3 %v2385_v11  ;;  %v3073_v47 = vld [vmem:[%s3980_s30 + $0xcc] sm:$0xf0]  ;;  %v3071_v48 = vld [vmem:[%s3980_s30 + $0xc4] sm:$0xf]  ;;  %v2569_v49 = vld [vmem:[%s3980_s30 + $0xd0] sm:$0xf0]  ;;  %v2596_v51 = vor.u32 %v3076_v42, %v2593_v45 }
  0x9e   : > { %v2568_v52 = vor.u32 %v3073_v47, %v2567_v46  ;;  %v2575_v53 = vld [vmem:[%s3980_s30 + $0xc8] sm:$0xf]  ;;  %v3074_v54 = vld [vmem:[%s3980_s30 + $0xd4] sm:$0xf0]  ;;  %v3072_v55 = vld [vmem:[%s3980_s30 + $0xcc] sm:$0xf]  ;;  %v2572_v56 = vor.u32 %v3071_v48, %v2569_v49 }
  0x9f   : > { %652 = vmatpush.bf16.msra.mxu0 %v2357_v17  ;;  %v2577_v57 = vld [vmem:[%s3980_s30 + $0xd8] sm:$0xf0]  ;;  %v2551_v58 = vld [vmem:[%s3980_s30 + $0xa0] sm:$0xf]  ;;  %v3069_v59 = vld [vmem:[%s3980_s30 + $0xac] sm:$0xf0]  ;;  %v2576_v62 = vor.u32 %v3074_v54, %v2575_v53 }
  0xa0   : > { %671 = vmatpush.bf16.msra.mxu1 %v2361_v20  ;;  %690 = vmatpush.bf16.msra.mxu2 %v2365_v21  ;;  %v3067_v60 = vld [vmem:[%s3980_s30 + $0xa4] sm:$0xf]  ;;  %v2553_v61 = vld [vmem:[%s3980_s30 + $0xb0] sm:$0xf0]  ;;  %v2580_v63 = vor.u32 %v3072_v55, %v2577_v57  ;;  %v2552_v0 = vor.u32 %v3069_v59, %v2551_v58  ;;  %v2559_v1 = vld [vmem:[%s3980_s30 + $0xa8] sm:$0xf] }
  0xa1   : > { %709 = vmatpush.bf16.msra.mxu3 %v2369_v25  ;;  %v3070_v2 = vld [vmem:[%s3980_s30 + $0xb4] sm:$0xf0]  ;;  %v3068_v3 = vld [vmem:[%s3980_s30 + $0xac] sm:$0xf]  ;;  %v2556_v4 = vor.u32 %v3067_v60, %v2553_v61  ;;  %v2561_v5 = vld [vmem:[%s3980_s30 + $0xb8] sm:$0xf0] }
  0xa2   : > { %v2535_v6 = vld [vmem:[%s3980_s30 + $0x80] sm:$0xf]  ;;  %v3065_v7 = vld [vmem:[%s3980_s30 + $0x8c] sm:$0xf0]  ;;  %v3063_v8 = vld [vmem:[%s3980_s30 + $0x84] sm:$0xf]  ;;  %v2560_v10 = vor.u32 %v3070_v2, %v2559_v1  ;;  %v2564_v12 = vor.u32 %v3068_v3, %v2561_v5 }
  0xa3   : > { %653 = vmatpush.bf16.msra.mxu0 %v2341_v32  ;;  %v2537_v9 = vld [vmem:[%s3980_s30 + $0x90] sm:$0xf0]  ;;  %v2543_v11 = vld [vmem:[%s3980_s30 + $0x88] sm:$0xf]  ;;  %v2536_v13 = vor.u32 %v3065_v7, %v2535_v6  ;;  %v3066_v14 = vld [vmem:[%s3980_s30 + $0x94] sm:$0xf0] }
  0xa4   : > { %672 = vmatpush.bf16.msra.mxu1 %v2345_v36  ;;  %691 = vmatpush.bf16.msra.mxu2 %v2349_v37  ;;  %v3064_v15 = vld [vmem:[%s3980_s30 + $0x8c] sm:$0xf]  ;;  %v2545_v16 = vld [vmem:[%s3980_s30 + $0x98] sm:$0xf0]  ;;  %v2540_v17 = vor.u32 %v3063_v8, %v2537_v9  ;;  %v440_v18 = vld [vmem:[%s3952_s1 + $0x10] sm:$0xff]  ;;  %v2544_v24 = vor.u32 %v3066_v14, %v2543_v11  ;;  %v3673_v36 = vmov 0  }
  0xa5   : > { %710 = vmatpush.bf16.msra.mxu3 %v2353_v38  ;;  %v2519_v19 = vld [vmem:[%s3980_s30 + $0x60] sm:$0xf]  ;;  %v3061_v20 = vld [vmem:[%s3980_s30 + $0x6c] sm:$0xf0]  ;;  %v441_v21 = vld [vmem:[%s3952_s1 + $0x18] sm:$0xff]  ;;  %v2548_v26 = vor.u32 %v3064_v15, %v2545_v16  ;;  %3329 = vset.pattern.permute.xlu0 %v3673_v36  ;;  %s4722_s1 = sld [smem:[#allocation20_spill]] }
  0xa6   : > { %654 = vmatmul.bf16.vlgmr.msra.gmra.mxu0 %v442_v43  ;;  %v3059_v22 = vld [vmem:[%s3980_s30 + $0x64] sm:$0xf]  ;;  %v2521_v23 = vld [vmem:[%s3980_s30 + $0x70] sm:$0xf0]  ;;  %v2520_v27 = vor.u32 %v3061_v20, %v2519_v19  ;;  %v2527_v28 = vld [vmem:[%s3980_s30 + $0x68] sm:$0xf]  ;;  %v443_v31 = vpack.c.bf16 %v441_v21, %v440_v18 }
  0xa7   : > { %954 = vmatpush.bf16.msrb.mxu0 %v2584_v39  ;;  %673 = vmatmul.bf16.vlgmr.msra.gmra.mxu1 %v442_v43  ;;  %v744_v25 = vld [vmem:[%s4721_s14] sm:$0xff]  ;;  %v3062_v29 = vld [vmem:[%s3980_s30 + $0x74] sm:$0xf0]  ;;  %v3060_v30 = vld [vmem:[%s3980_s30 + $0x6c] sm:$0xf]  ;;  %v2524_v32 = vor.u32 %v3059_v22, %v2521_v23  ;;  %s4128_s6 = ssub.s32 1, %s4723_s7 }
  0xa8   : > { %967 = vmatpush.bf16.msrb.mxu1 %v2588_v44  ;;  %692 = vmatmul.bf16.vlgmr.msra.gmra.mxu2 %v442_v43  ;;  %v2529_v33 = vld [vmem:[%s3980_s30 + $0x78] sm:$0xf0]  ;;  %v2503_v34 = vld [vmem:[%s3980_s30 + $0x40] sm:$0xf]  ;;  %v3057_v35 = vld [vmem:[%s3980_s30 + $0x4c] sm:$0xf0]  ;;  %v2528_v39 = vor.u32 %v3062_v29, %v2527_v28 }
  0xa9   : > { %711 = vmatmul.bf16.vlgmr.msra.gmra.mxu3 %v442_v43  ;;  %980 = vmatpush.bf16.msrb.mxu2 %v2592_v50  ;;  %v3055_v37 = vld [vmem:[%s3980_s30 + $0x44] sm:$0xf]  ;;  %v2505_v38 = vld [vmem:[%s3980_s30 + $0x50] sm:$0xf0]  ;;  %v2532_v40 = vor.u32 %v3060_v30, %v2529_v33  ;;  %v2504_v41 = vor.u32 %v3057_v35, %v2503_v34  ;;  %v2511_v42 = vld [vmem:[%s3980_s30 + $0x48] sm:$0xf] }
  0xaa   : > { %993 = vmatpush.bf16.msrb.mxu3 %v2596_v51  ;;  %746 = vperm.xlu0 %3329, %v744_v25   ;;  %v3058_v43 = vld [vmem:[%s3980_s30 + $0x54] sm:$0xf0]  ;;  %v3056_v44 = vld [vmem:[%s3980_s30 + $0x4c] sm:$0xf]  ;;  %v2508_v45 = vor.u32 %v3055_v37, %v2505_v38  ;;  %v2513_v46 = vld [vmem:[%s3980_s30 + $0x58] sm:$0xf0] }
  0xab   : > { %955 = vmatpush.bf16.msrb.mxu0 %v2568_v52  ;;  %v2487_v47 = vld [vmem:[%s3980_s30 + $0x20] sm:$0xf]  ;;  %v3053_v48 = vld [vmem:[%s3980_s30 + $0x2c] sm:$0xf0]  ;;  %v3051_v49 = vld [vmem:[%s3980_s30 + $0x24] sm:$0xf]  ;;  %v2512_v51 = vor.u32 %v3058_v43, %v2511_v42  ;;  %v2516_v52 = vor.u32 %v3056_v44, %v2513_v46  ;;  %s739_s11 = smul.u32 %s4722_s1, %s4128_s6 }
  0xac   : > { %968 = vmatpush.bf16.msrb.mxu1 %v2572_v56  ;;  %v2489_v50 = vld [vmem:[%s3980_s30 + $0x30] sm:$0xf0]  ;;  %v2488_v53 = vor.u32 %v3053_v48, %v2487_v47  ;;  %v2495_v54 = vld [vmem:[%s3980_s30 + $0x28] sm:$0xf]  ;;  %v3054_v55 = vld [vmem:[%s3980_s30 + $0x34] sm:$0xf0] }
  0xad   : > { %981 = vmatpush.bf16.msrb.mxu2 %v2576_v62  ;;  %v3052_v56 = vld [vmem:[%s3980_s30 + $0x2c] sm:$0xf]  ;;  %v2492_v57 = vor.u32 %v3051_v49, %v2489_v50  ;;  %v2497_v58 = vld [vmem:[%s3980_s30 + $0x38] sm:$0xf0]  ;;  %v2471_v59 = vld [vmem:[%s3980_s30] sm:$0xf] }
  0xae   : > { %994 = vmatpush.bf16.msrb.mxu3 %v2580_v63  ;;  %v3049_v60 = vld [vmem:[%s3980_s30 + $0xc] sm:$0xf0]  ;;  %v3047_v61 = vld [vmem:[%s3980_s30 + $0x4] sm:$0xf]  ;;  %v2473_v62 = vld [vmem:[%s3980_s30 + $0x10] sm:$0xf0]  ;;  %v2496_v63 = vor.u32 %v3054_v55, %v2495_v54 }
  0xaf   : > { %956 = vmatpush.bf16.msrb.mxu0 %v2552_v0  ;;  %v2500_v0 = vor.u32 %v3052_v56, %v2497_v58  ;;  %v2472_v1 = vor.u32 %v3049_v60, %v2471_v59  ;;  %v2479_v2 = vld [vmem:[%s3980_s30 + $0x8] sm:$0xf]  ;;  %v3050_v3 = vld [vmem:[%s3980_s30 + $0x14] sm:$0xf0]  ;;  %v3048_v5 = vld [vmem:[%s3980_s30 + $0xc] sm:$0xf] }
  0xb0   : > { %969 = vmatpush.bf16.msrb.mxu1 %v2556_v4  ;;  %v2476_v4 = vor.u32 %v3047_v61, %v2473_v62  ;;  %v2481_v6 = vld [vmem:[%s3980_s30 + $0x18] sm:$0xf0]  ;;  %v4122_v7 = vld [vmem:[#allocation2] sm:$0xff]  ;;  %v2480_v8 = vor.u32 %v3050_v3, %v2479_v2  ;;  %s740_s15 = ssub.s32 1, %s4722_s1  ;;  %s2600_s13 = sshll.u32 %s4723_s7, 1 }
  0xb1   : > { %982 = vmatpush.bf16.msrb.mxu2 %v2560_v10  ;;  %v2484_v9 = vor.u32 %v3048_v5, %v2481_v6  ;;  %v761_v10 = vpack.c.bf16 %v4122_v7, %v4122_v7  ;;  %s741_s3 = smul.u32 %s4723_s7, %s740_s15  ;;  %s2735_s12 = sshll.u32 %s4128_s6, 1  ;;  %v476_v11 = vld [vmem:[%s3978_s4] sm:$0xf]  ;;  %v2718_v44 = vld [vmem:[%s3980_s30 + $0xe0] sm:$0xf] }
  0xb2   : > { %995 = vmatpush.bf16.msrb.mxu3 %v2564_v12  ;;  %s4138_s25 = sadd.s32 %s2600_s13, %s4128_s6  ;;  %s1745_s9 = smul.u32 3, %s4128_s6  ;;  %v478_v12 = vperm.slane %v476_v11, 0  ;;  %v4155_v18 = vperm.slane %v476_v11, 2  ;;  %v4157_v19 = vperm.slane %v476_v11, 3  ;;  %v3108_v47 = vld [vmem:[%s3980_s30 + $0xe4] sm:$0xf] }
  0xb3   : > { %957 = vmatpush.bf16.msrb.mxu0 %v2536_v13  ;;  %s4134_s2 = sadd.s32 %s741_s3, %s739_s11  ;;  %s4145_s0 = sadd.s32 %s4723_s7, %s2735_s12  ;;  %v479_v13 = vperm.slane %v476_v11, 1  ;;  %v2720_v48 = vld [vmem:[%s3980_s30 + $0xf0] sm:$0xf0]  ;;  %v2726_v50 = vld [vmem:[%s3980_s30 + $0xe8] sm:$0xf] }
  0xb4   : > { %970 = vmatpush.bf16.msrb.mxu1 %v2540_v17  ;;  %s4142_s18 = sshll.u32 %s4134_s2, 2  ;;  %s751_s4 = smul.u32 24, %s4723_s7  ;;  %v2723_v49 = vor.u32 %v3108_v47, %v2720_v48  ;;  %v2728_v54 = vld [vmem:[%s3980_s30 + $0xf8] sm:$0xf0]  ;;  %v2702_v56 = vld [vmem:[%s3980_s30 + $0xc0] sm:$0xf] }
  0xb5   : > { %983 = vmatpush.bf16.msrb.mxu2 %v2544_v24  ;;  %s1405_s14 = sadd.s32 %s4142_s18, %s4138_s25  ;;  %s1737_s1 = sadd.s32 %s4142_s18, %s4145_s0  ;;  %v3104_v58 = vld [vmem:[%s3980_s30 + $0xc4] sm:$0xf]  ;;  %v2704_v61 = vld [vmem:[%s3980_s30 + $0xd0] sm:$0xf0]  ;;  %v2710_v62 = vld [vmem:[%s3980_s30 + $0xc8] sm:$0xf] }
  0xb6   : > { %996 = vmatpush.bf16.msrb.mxu3 %v2548_v26  ;;  %659 = vmatmul.bf16.gmra.mxu0 %v443_v31  ;;  %s4152_s15 = sadd.s32 %s4142_s18, %s1745_s9  ;;  %s4174_s11 = sshra.s32 %s751_s4, 3  ;;  %v2707_v3 = vor.u32 %v3104_v58, %v2704_v61  ;;  %v3105_v5 = vld [vmem:[%s3980_s30 + $0xcc] sm:$0xf]  ;;  %v2712_v6 = vld [vmem:[%s3980_s30 + $0xd8] sm:$0xf0] }
  0xb7   : > { %958 = vmatpush.bf16.msrb.mxu0 %v2520_v27  ;;  %678 = vmatmul.bf16.gmra.mxu1 %v443_v31  ;;  %s3046_s3 = sshll.u32 %s4174_s11, 5  ;;  %v2686_v11 = vld [vmem:[%s3980_s30 + $0xa0] sm:$0xf]  ;;  %v2656_v48 = vld [vmem:[%s3980_s30 + $0x70] sm:$0xf0]  ;;  %s750_s12 = smul.u32 3, %s4723_s7 }
  0xb8   : > { %971 = vmatpush.bf16.msrb.mxu1 %v2524_v32  ;;  %697 = vmatmul.bf16.gmra.mxu2 %v443_v31  ;;  %s4212_s13 = scalar_lea.vmem [#allocation4], %s3046_s3  ;;  %v2638_v61 = vld [vmem:[%s3980_s30 + $0x40] sm:$0xf] }
  0xb9   : > { %716 = vmatmul.bf16.gmra.mxu3 %v443_v31  ;;  %984 = vmatpush.bf16.msrb.mxu2 %v2528_v39  ;;  %s1073_s9 = sadd.s32 %s4142_s18, %s750_s12  ;;  %s1077_s18 = scalar_lea.vmem %s3982_s16, %s751_s4 [#allocation11] }
  0xba   : > { %997 = vmatpush.bf16.msrb.mxu3 %v2532_v40 }
  0xbb   : > { %959 = vmatpush.bf16.msrb.mxu0 %v2504_v41 }
  0xbc   : > { %972 = vmatpush.bf16.msrb.mxu1 %v2508_v45  ;;  %v3110_v45 = vld [vmem:[%s3980_s30 + $0xec] sm:$0xf0] }
  0xbd   : > { %985 = vmatpush.bf16.msrb.mxu2 %v2512_v51  ;;  %v2719_v46 = vor.u32 %v3110_v45, %v2718_v44  ;;  %v3111_v51 = vld [vmem:[%s3980_s30 + $0xf4] sm:$0xf0] }
  0xbe   : > { %998 = vmatpush.bf16.msrb.mxu3 %v2516_v52  ;;  %v2727_v52 = vor.u32 %v3111_v51, %v2726_v50 }
  0xbf   : > { %960 = vmatpush.bf16.msrb.mxu0 %v2488_v53  ;;  %v3109_v53 = vld [vmem:[%s3980_s30 + $0xec] sm:$0xf] }
  0xc0   : > { %973 = vmatpush.bf16.msrb.mxu1 %v2492_v57  ;;  %v2731_v55 = vor.u32 %v3109_v53, %v2728_v54  ;;  %v3106_v57 = vld [vmem:[%s3980_s30 + $0xcc] sm:$0xf0]  ;;  %v3093_v53 = vld [vmem:[%s3980_s30 + $0x6c] sm:$0xf]  ;;  %v2664_v54 = vld [vmem:[%s3980_s30 + $0x78] sm:$0xf0] }
  0xc1   : > { %986 = vmatpush.bf16.msrb.mxu2 %v2496_v63  ;;  %v2703_v60 = vor.u32 %v3106_v57, %v2702_v56  ;;  %v3107_v63 = vld [vmem:[%s3980_s30 + $0xd4] sm:$0xf0] }
  0xc2   : > { %999 = vmatpush.bf16.msrb.mxu3 %v2500_v0 }
  0xc3   : > { %961 = vmatpush.bf16.msrb.mxu0 %v2472_v1 }
  0xc4   : > { %974 = vmatpush.bf16.msrb.mxu1 %v2476_v4  ;;  %v2711_v4 = vor.u32 %v3107_v63, %v2710_v62  ;;  %v3090_v62 = vld [vmem:[%s3980_s30 + $0x4c] sm:$0xf0]  ;;  %v3088_v63 = vld [vmem:[%s3980_s30 + $0x44] sm:$0xf] }
  0xc5   : > { %987 = vmatpush.bf16.msrb.mxu2 %v2480_v8 }
  0xc6   : > { %1000 = vmatpush.bf16.msrb.mxu3 %v2484_v9  ;;  %962 = vmatmul.bf16.vlgmr.msrb.gmra.mxu0 %v761_v10 }
  0xc7   : > { %975 = vmatmul.bf16.vlgmr.msrb.gmra.mxu1 %v761_v10  ;;  %1286 = vmatpush.bf16.msra.mxu0 %v2719_v46 }
  0xc8   : > { %988 = vmatmul.bf16.vlgmr.msrb.gmra.mxu2 %v761_v10  ;;  %1299 = vmatpush.bf16.msra.mxu1 %v2723_v49  ;;  %v2662_v49 = vld [vmem:[%s3980_s30 + $0x68] sm:$0xf] }
  0xc9   : > { %1001 = vmatmul.bf16.vlgmr.msrb.gmra.mxu3 %v761_v10  ;;  %1312 = vmatpush.bf16.msra.mxu2 %v2727_v52  ;;  %v2715_v10 = vor.u32 %v3105_v5, %v2712_v6  ;;  %v3095_v52 = vld [vmem:[%s3980_s30 + $0x74] sm:$0xf0] }
  0xca   : > { %1325 = vmatpush.bf16.msra.mxu3 %v2731_v55  ;;  %v2663_v57 = vor.u32 %v3095_v52, %v2662_v49 }
  0xcb   : > { %1287 = vmatpush.bf16.msra.mxu0 %v2703_v60 }
  0xcc   : > { %1300 = vmatpush.bf16.msra.mxu1 %v2707_v3  ;;  %v2646_v3 = vld [vmem:[%s3980_s30 + $0x48] sm:$0xf] }
  0xcd   : > { %1313 = vmatpush.bf16.msra.mxu2 %v2711_v4  ;;  %v3091_v4 = vld [vmem:[%s3980_s30 + $0x54] sm:$0xf0] }
  0xce   : > { %1326 = vmatpush.bf16.msra.mxu3 %v2715_v10  ;;  %v2647_v6 = vor.u32 %v3091_v4, %v2646_v3  ;;  %v749_v3 = vld [vmem:[#allocation3] sm:$0xff] }
 0x123   : > { %v655_v14 = vpop.f32.mrf.mxu0 }
 0x124   : > { %v656_v15 = vadd.f32 %v655_v14, %v478_v12  ;;  %v674_v16 = vpop.f32.mrf.mxu1  ;;  %v3100_v14 = vld [vmem:[%s3980_s30 + $0xa4] sm:$0xf] }
 0x125   : > { %v675_v17 = vadd.f32 %v674_v16, %v479_v13 }
 0x126   : > { %722 = vst [vmem:[#allocation4] sm:$0xff] %v656_v15  ;;  %v2688_v15 = vld [vmem:[%s3980_s30 + $0xb0] sm:$0xf0] }
 0x127   : > { %723 = vst [vmem:[#allocation4 + $0x8] sm:$0xff] %v675_v17  ;;  %v2691_v16 = vor.u32 %v3100_v14, %v2688_v15  ;;  %v2694_v17 = vld [vmem:[%s3980_s30 + $0xa8] sm:$0xf]  ;;  %v2624_v15 = vld [vmem:[%s3980_s30 + $0x30] sm:$0xf0] }
 0x129   : > { %1301 = vmatpush.bf16.msra.mxu1 %v2691_v16  ;;  %v2630_v16 = vld [vmem:[%s3980_s30 + $0x28] sm:$0xf] }
 0x12b   : > { %v693_v20 = vpop.f32.mrf.mxu2  ;;  %v657_v23 = vpop.f32.mrf.mxu0 }
 0x12c   : > { %v694_v21 = vadd.f32 %v693_v20, %v4155_v18  ;;  %v712_v22 = vpop.f32.mrf.mxu3  ;;  %v658_v25 = vadd.f32 %v657_v23, %v478_v12  ;;  %v676_v26 = vpop.f32.mrf.mxu1  ;;  %v2670_v23 = vld [vmem:[%s3980_s30 + $0x80] sm:$0xf] }
 0x12d   : > { %v713_v24 = vadd.f32 %v712_v22, %v4157_v19  ;;  %v677_v27 = vadd.f32 %v676_v26, %v479_v13 }
 0x12e   : > { %724 = vst [vmem:[#allocation4 + $0x10] sm:$0xff] %v694_v21  ;;  %v2696_v21 = vld [vmem:[%s3980_s30 + $0xb8] sm:$0xf0] }
 0x12f   : > { %725 = vst [vmem:[#allocation4 + $0x18] sm:$0xff] %v713_v24  ;;  %v3098_v24 = vld [vmem:[%s3980_s30 + $0x8c] sm:$0xf0] }
 0x130   : > { %726 = vst [vmem:[#allocation4 + $0x20] sm:$0xff] %v658_v25  ;;  %v3096_v25 = vld [vmem:[%s3980_s30 + $0x84] sm:$0xf] }
 0x131   : > { %727 = vst [vmem:[#allocation4 + $0x28] sm:$0xff] %v677_v27  ;;  %v2671_v27 = vor.u32 %v3098_v24, %v2670_v23 }
 0x133   : > { %v695_v28 = vpop.f32.mrf.mxu2  ;;  %v660_v31 = vpop.f32.mrf.mxu0 }
 0x134   : > { %v696_v29 = vadd.f32 %v695_v28, %v4155_v18  ;;  %v714_v30 = vpop.f32.mrf.mxu3  ;;  %v661_v33 = vadd.f32 %v660_v31, %v478_v12  ;;  %v679_v34 = vpop.f32.mrf.mxu1  ;;  %v2672_v28 = vld [vmem:[%s3980_s30 + $0x90] sm:$0xf0] }
 0x135   : > { %v715_v32 = vadd.f32 %v714_v30, %v4157_v19  ;;  %v680_v35 = vadd.f32 %v679_v34, %v479_v13  ;;  %v3099_v30 = vld [vmem:[%s3980_s30 + $0x94] sm:$0xf0] }
 0x136   : > { %728 = vst [vmem:[#allocation4 + $0x30] sm:$0xff] %v696_v29  ;;  %v2678_v29 = vld [vmem:[%s3980_s30 + $0x88] sm:$0xf] }
 0x137   : > { %729 = vst [vmem:[#allocation4 + $0x38] sm:$0xff] %v715_v32  ;;  %v2679_v34 = vor.u32 %v3099_v30, %v2678_v29 }
 0x138   : > { %730 = vst [vmem:[#allocation4 + $0x40] sm:$0xff] %v661_v33  ;;  %v2675_v33 = vor.u32 %v3096_v25, %v2672_v28 }
 0x139   : > { %731 = vst [vmem:[#allocation4 + $0x48] sm:$0xff] %v680_v35  ;;  %v3097_v35 = vld [vmem:[%s3980_s30 + $0x8c] sm:$0xf] }
 0x13a   : > { %1302 = vmatpush.bf16.msra.mxu1 %v2675_v33  ;;  %v3082_v33 = vld [vmem:[%s3980_s30 + $0xc] sm:$0xf0] }
 0x13b   : > { %v698_v36 = vpop.f32.mrf.mxu2  ;;  %v662_v39 = vpop.f32.mrf.mxu0 }
 0x13c   : > { %v699_v37 = vadd.f32 %v698_v36, %v4155_v18  ;;  %v717_v38 = vpop.f32.mrf.mxu3  ;;  %v663_v41 = vadd.f32 %v662_v39, %v478_v12  ;;  %v681_v42 = vpop.f32.mrf.mxu1  ;;  %v3102_v12 = vld [vmem:[%s3980_s30 + $0xac] sm:$0xf0]  ;;  %v2680_v36 = vld [vmem:[%s3980_s30 + $0x98] sm:$0xf0]  ;;  %v2654_v39 = vld [vmem:[%s3980_s30 + $0x60] sm:$0xf] }
 0x13d   : > { %v718_v40 = vadd.f32 %v717_v38, %v4157_v19  ;;  %v682_v43 = vadd.f32 %v681_v42, %v479_v13  ;;  %v2687_v13 = vor.u32 %v3102_v12, %v2686_v11  ;;  %v2683_v38 = vor.u32 %v3097_v35, %v2680_v36  ;;  %v2622_v11 = vld [vmem:[%s3980_s30 + $0x20] sm:$0xf]  ;;  %v3086_v12 = vld [vmem:[%s3980_s30 + $0x2c] sm:$0xf0]  ;;  %v4256_v35 = vpop.permute.xlu0 %746  ;;  %v2608_v36 = vld [vmem:[%s3980_s30 + $0x10] sm:$0xf0] }
 0x13e   : > { %732 = vst [vmem:[#allocation4 + $0x50] sm:$0xff] %v699_v37  ;;  %v2623_v14 = vor.u32 %v3086_v12, %v2622_v11 }
 0x13f   : > { %733 = vst [vmem:[#allocation4 + $0x58] sm:$0xff] %v718_v40  ;;  %1288 = vmatpush.bf16.msra.mxu0 %v2687_v13  ;;  %v3094_v40 = vld [vmem:[%s3980_s30 + $0x6c] sm:$0xf0]  ;;  %v3084_v13 = vld [vmem:[%s3980_s30 + $0x24] sm:$0xf] }
 0x140   : > { %734 = vst [vmem:[#allocation4 + $0x60] sm:$0xff] %v663_v41  ;;  %v3092_v41 = vld [vmem:[%s3980_s30 + $0x64] sm:$0xf]  ;;  %v2655_v44 = vor.u32 %v3094_v40, %v2654_v39  ;;  %v4266_v39 = vstv %s1737_s1  ;;  %v3081_v40 = vld [vmem:[%s3980_s30 + $0xc] sm:$0xf] }
 0x141   : > { %735 = vst [vmem:[#allocation4 + $0x68] sm:$0xff] %v682_v43  ;;  %v2659_v51 = vor.u32 %v3092_v41, %v2656_v48  ;;  %v2616_v41 = vld [vmem:[%s3980_s30 + $0x18] sm:$0xf0]  ;;  %vm1739_vm1 = vcmp.lt.s32.totalorder %v4266_v39, %v4256_v35 }
 0x143   : > { %v700_v59 = vpop.f32.mrf.mxu2  ;;  %v963_v2 = vpop.f32.mrf.mxu0  ;;  %1289 = vmatpush.bf16.msra.mxu0 %v2671_v27  ;;  %1303 = vmatpush.bf16.msra.mxu1 %v2659_v51  ;;  %v2619_v51 = vor.u32 %v3081_v40, %v2616_v41  ;;  %v3142_v40 = vld [vmem:[%s3980_s30 + $0xec] sm:$0xf]  ;;  %v2863_v41 = vld [vmem:[%s3980_s30 + $0xf8] sm:$0xf0] }
 0x144   : > { %v701_v0 = vadd.f32 %v700_v59, %v4155_v18  ;;  %v719_v1 = vpop.f32.mrf.mxu3  ;;  %v976_v9 = vpop.f32.mrf.mxu1  ;;  %v3103_v18 = vld [vmem:[%s3980_s30 + $0xb4] sm:$0xf0]  ;;  %v2667_v59 = vor.u32 %v3093_v53, %v2664_v54 }
 0x145   : > { %v720_v8 = vadd.f32 %v719_v1, %v4157_v19  ;;  %v3101_v19 = vld [vmem:[%s3980_s30 + $0xac] sm:$0xf]  ;;  %v2695_v20 = vor.u32 %v3103_v18, %v2694_v17  ;;  %v2639_v1 = vor.u32 %v3090_v62, %v2638_v61  ;;  %v3087_v17 = vld [vmem:[%s3980_s30 + $0x34] sm:$0xf0] }
 0x146   : > { %736 = vst [vmem:[#allocation4 + $0x70] sm:$0xff] %v701_v0  ;;  %v2699_v22 = vor.u32 %v3101_v19, %v2696_v21  ;;  %v2627_v19 = vor.u32 %v3084_v13, %v2624_v15  ;;  %v3085_v21 = vld [vmem:[%s3980_s30 + $0x2c] sm:$0xf] }
 0x147   : > { %737 = vst [vmem:[#allocation4 + $0x78] sm:$0xff] %v720_v8  ;;  %1314 = vmatpush.bf16.msra.mxu2 %v2695_v20  ;;  %1290 = vmatpush.bf16.msra.mxu0 %v2655_v44  ;;  %v3089_v8 = vld [vmem:[%s3980_s30 + $0x4c] sm:$0xf]  ;;  %v2631_v20 = vor.u32 %v3087_v17, %v2630_v16 }
 0x148   : > { %1327 = vmatpush.bf16.msra.mxu3 %v2699_v22  ;;  %v2632_v22 = vld [vmem:[%s3980_s30 + $0x38] sm:$0xf0] }
 0x149   : > { %v2635_v25 = vor.u32 %v3085_v21, %v2632_v22 }
 0x14b   : > { %v4200_v26 = vpop.f32.mrf.mxu2  ;;  %v965_v31 = vpop.f32.mrf.mxu0  ;;  %1315 = vmatpush.bf16.msra.mxu2 %v2679_v34  ;;  %1291 = vmatpush.bf16.msra.mxu0 %v2639_v1  ;;  %v3080_v34 = vld [vmem:[%s3980_s30 + $0x4] sm:$0xf] }
 0x14c   : > { %v1002_v32 = vpop.f32.mrf.mxu3  ;;  %v978_v37 = vpop.f32.mrf.mxu1  ;;  %1328 = vmatpush.bf16.msra.mxu3 %v2683_v38  ;;  %v4250_v31 = vstv %s1405_s14  ;;  %v3083_v38 = vld [vmem:[%s3980_s30 + $0x14] sm:$0xf0]  ;;  %s2601_s14 = sshll.u32 %s4138_s25, 3  ;;  %s2736_s25 = sshll.u32 %s4145_s0, 3 }
 0x14d   : > { %v2614_v37 = vld [vmem:[%s3980_s30 + $0x8] sm:$0xf]  ;;  %vm1407_vm0 = vcmp.lt.s32.totalorder %v4250_v31, %v4256_v35  ;;  %s4325_s1 = sshra.s32 %s2601_s14, 3  ;;  %s1409_s11 = scalar_lea.vmem %s3982_s16, %s2601_s14 [#allocation11]  ;;  %v3176_v31 = vld [vmem:[%s3980_s30 + $0xec] sm:$0xf0] }
 0x14e   : > { %v757_v42 = vld [vmem:[%s4212_s13] sm:$0xff]  ;;  %v758_v43 = vld [vmem:[%s4212_s13 + $0x8] sm:$0xff]  ;;  %v760_v47 = vld [vmem:[%s4212_s13 + $0x18] sm:$0xff]  ;;  %v2615_v48 = vor.u32 %v3083_v38, %v2614_v37  ;;  %s4416_s3 = sshra.s32 %s2736_s25, 3  ;;  %s1746_s0 = smul.u32 24, %s4128_s6 }
 0x14f   : > { %v1006_v45 = vadd.f32 %v963_v2, %v757_v42  ;;  %v1007_v46 = vadd.f32 %v976_v9, %v758_v43  ;;  %v1009_v50 = vadd.f32 %v1002_v32, %v760_v47  ;;  %1316 = vmatpush.bf16.msra.mxu2 %v2663_v57  ;;  %v2640_v2 = vld [vmem:[%s3980_s30 + $0x50] sm:$0xf0]  ;;  %v2648_v9 = vld [vmem:[%s3980_s30 + $0x58] sm:$0xf0]  ;;  %1292 = vmatpush.bf16.msra.mxu0 %v2623_v14  ;;  %v759_v29 = vld [vmem:[%s4212_s13 + $0x10] sm:$0xff]  ;;  %v2069_v42 = vstv %s4152_s15  ;;  %s3079_s15 = sshll.u32 %s4325_s1, 5 }
 0x150   : > { %1329 = vmatpush.bf16.msra.mxu3 %v2667_v59  ;;  %v2643_v5 = vor.u32 %v3088_v63, %v2640_v2  ;;  %v2651_v10 = vor.u32 %v3089_v8, %v2648_v9  ;;  %v2606_v32 = vld [vmem:[%s3980_s30] sm:$0xf]  ;;  %vm4275_vm2 = vcmp.lt.s32.totalorder %v2069_v42, %v4256_v35  ;;  %v2611_v47 = vor.u32 %v3080_v34, %v2608_v36  ;;  %v2861_v34 = vld [vmem:[%s3980_s30 + $0xe8] sm:$0xf]  ;;  %v3144_v36 = vld [vmem:[%s3980_s30 + $0xf4] sm:$0xf0] }
 0x151   : > { %v2597_v55 = vmul.f32 -1.442695, %v1006_v45  ;;  %v2598_v56 = vmul.f32 -1.442695, %v1007_v46  ;;  %v2599_v58 = vmul.f32 -1.442695, %v1009_v50  ;;  %v2607_v43 = vor.u32 %v3082_v33, %v2606_v32 }
 0x152   : > { %1304 = vmatpush.bf16.msra.mxu1 %v2643_v5  ;;  %v1008_v45 = vadd.f32 %v4200_v26, %v759_v29  ;;  %v1074_v9 = vstv %s1073_s9  ;;  %v2853_v29 = vld [vmem:[%s3980_s30 + $0xe0] sm:$0xf]  ;;  %v3141_v32 = vld [vmem:[%s3980_s30 + $0xe4] sm:$0xf]  ;;  %v2855_v33 = vld [vmem:[%s3980_s30 + $0xf0] sm:$0xf0]  ;;  %v2862_v38 = vor.u32 %v3144_v36, %v2861_v34  ;;  %v2866_v42 = vor.u32 %v3142_v40, %v2863_v41 }
 0x153   : > { %3330 = vpow2.f32 %v2597_v55  ;;  %v991_v60 = vpop.f32.mrf.mxu2  ;;  %1317 = vmatpush.bf16.msra.mxu2 %v2647_v6  ;;  %1293 = vmatpush.bf16.msra.mxu0 %v2607_v43  ;;  %vm4291_vm11 = vcmp.lt.s32.totalorder %v1074_v9, %v4256_v35  ;;  %v2858_v37 = vor.u32 %v3141_v32, %v2855_v33  ;;  %v2837_v43 = vld [vmem:[%s3980_s30 + $0xc0] sm:$0xf]  ;;  %v2813_v9 = vld [vmem:[%s3980_s30 + $0x88] sm:$0xf]  ;;  %v2815_v14 = vld [vmem:[%s3980_s30 + $0x98] sm:$0xf0] }
 0x154   : > { %3332 = vpow2.f32 %v2598_v56  ;;  %v1004_v0 = vpop.f32.mrf.mxu3  ;;  %1330 = vmatpush.bf16.msra.mxu3 %v2651_v10  ;;  %s4354_s4 = scalar_lea.vmem [#allocation4], %s3079_s15  ;;  %v3128_v32 = vld [vmem:[%s3980_s30 + $0x74] sm:$0xf0]  ;;  %v3126_v34 = vld [vmem:[%s3980_s30 + $0x6c] sm:$0xf]  ;;  %s3112_s13 = sshll.u32 %s4416_s3, 5 }
 0x155   : > { %3334 = vpow2.f32 %v2599_v58  ;;  %v2799_v36 = vld [vmem:[%s3980_s30 + $0x78] sm:$0xf0]  ;;  %v2773_v41 = vld [vmem:[%s3980_s30 + $0x40] sm:$0xf]  ;;  %s4445_s12 = scalar_lea.vmem [#allocation4], %s3112_s13  ;;  %s1747_s9 = sshra.s32 %s1746_s0, 3 }
 0x156   : > { %1305 = vmatpush.bf16.msra.mxu1 %v2627_v19  ;;  %v2802_v40 = vor.u32 %v3126_v34, %v2799_v36  ;;  %s3178_s1 = sshll.u32 %s4134_s2, 3 }
 0x157   : > { %1318 = vmatpush.bf16.msra.mxu2 %v2631_v20  ;;  %s2101_s15 = sadd.s32 %s4723_s7, %s3178_s1 }
 0x158   : > { %1331 = vmatpush.bf16.msra.mxu3 %v2635_v25  ;;  %s3007_s2 = sshll.u32 %s2101_s15, 3  ;;  %s4730_s15 = sld [smem:[#allocation38_spill]] }
 0x159   : > { %v3331_v18 = vpop.eup %3330 }
 0x15a   : > { %v3333_v23 = vpop.eup %3332  ;;  %v4238_v24 = vadd.f32 1.0, %v3331_v18  ;;  %1306 = vmatpush.bf16.msra.mxu1 %v2611_v47 }
 0x15b   : > { %v3335_v27 = vpop.eup %3334  ;;  %v4240_v28 = vadd.f32 1.0, %v3333_v23  ;;  %1319 = vmatpush.bf16.msra.mxu2 %v2615_v48  ;;  %v2839_v48 = vld [vmem:[%s3980_s30 + $0xd0] sm:$0xf0] }
 0x15c   : > { %3336 = vrcp.f32 %v4238_v24  ;;  %v4245_v30 = vadd.f32 1.0, %v3335_v27  ;;  %1332 = vmatpush.bf16.msra.mxu3 %v2619_v51  ;;  %v1025_v55 = vand.u32 2147483648, %v4238_v24  ;;  %v1023_v59 = vand.u32 2147483647, %v4238_v24 }
 0x15d   : > { %3338 = vrcp.f32 %v4240_v28  ;;  %v1044_v57 = vand.u32 2147483648, %v4240_v28  ;;  %v1042_v61 = vand.u32 2147483647, %v4240_v28  ;;  %vm1019_vm5 = vweird.f32 %v4238_v24 }
 0x15e   : > { %3340 = vrcp.f32 %v4245_v30  ;;  %vm1038_vm6 = vweird.f32 %v4240_v28  ;;  %v1026_v0 = vor.u32 1.1754944e-38, %v1025_v55  ;;  %vm1024_vm8 = vcmp.eq.f32.partialorder %v1023_v59, 8.507059e+37  ;;  %1631 = vmatpush.bf16.msrb.mxu1 %v2858_v37  ;;  %v2821_v55 = vld [vmem:[%s3980_s30 + $0xa0] sm:$0xf]  ;;  %v2823_v59 = vld [vmem:[%s3980_s30 + $0xb0] sm:$0xf0] }
 0x15f   : > { %3342 = vtanh.f32 %v1008_v45  ;;  %v1045_v4 = vor.u32 1.1754944e-38, %v1044_v57  ;;  %vm1043_vm10 = vcmp.eq.f32.partialorder %v1042_v61, 8.507059e+37  ;;  %v1064_v17 = vand.u32 2147483648, %v4245_v30  ;;  %1644 = vmatpush.bf16.msrb.mxu2 %v2862_v38  ;;  %v3137_v45 = vld [vmem:[%s3980_s30 + $0xc4] sm:$0xf] }
 0x160   : > { %vm1058_vm13 = vweird.f32 %v4245_v30  ;;  %v1062_v19 = vand.u32 2147483647, %v4245_v30  ;;  %1657 = vmatpush.bf16.msrb.mxu3 %v2866_v42  ;;  %v2842_v51 = vor.u32 %v3137_v45, %v2839_v48  ;;  %v3133_v57 = vld [vmem:[%s3980_s30 + $0xa4] sm:$0xf]  ;;  %v3136_v61 = vld [vmem:[%s3980_s30 + $0xb4] sm:$0xf0] }
 0x161   : > { %v1065_v21 = vor.u32 1.1754944e-38, %v1064_v17  ;;  %v3123_v42 = vld [vmem:[%s3980_s30 + $0x4c] sm:$0xf0]  ;;  %v2781_v48 = vld [vmem:[%s3980_s30 + $0x48] sm:$0xf] }
 0x162   : > { %v3337_v44 = vpop.eup %3336  ;;  %vm1063_vm15 = vcmp.eq.f32.partialorder %v1062_v19, 8.507059e+37  ;;  %1632 = vmatpush.bf16.msrb.mxu1 %v2842_v51  ;;  %v2774_v45 = vor.u32 %v3123_v42, %v2773_v41 }
 0x163   : > { %v3339_v49 = vpop.eup %3338  ;;  %v1015_v50 = vmul.f32 %v3337_v44, %v4238_v24  ;;  %vm1020_vm3 = vweird.f32 %v3337_v44 }
 0x164   : > { %v1034_v52 = vmul.f32 %v3339_v49, %v4240_v28  ;;  %v3341_v53 = vpop.eup %3340  ;;  %vm1039_vm4 = vweird.f32 %v3339_v49  ;;  %vm1021_vm7 = vmor %vm1019_vm5, %vm1020_vm3 }
 0x165   : > { %v1016_v54 = vsub.f32 1.0, %v1015_v50  ;;  %v1054_v56 = vmul.f32 %v3341_v53, %v4245_v30  ;;  %vm1040_vm9 = vmor %vm1038_vm6, %vm1039_vm4  ;;  %v3343_v5 = vpop.eup %3342  ;;  %vm1059_vm12 = vweird.f32 %v3341_v53  ;;  %v3143_v30 = vld [vmem:[%s3980_s30 + $0xec] sm:$0xf0]  ;;  %v3140_v50 = vld [vmem:[%s3980_s30 + $0xd4] sm:$0xf0] }
 0x166   : > { %v1035_v26 = vsub.f32 1.0, %v1034_v52  ;;  %vm1060_vm14 = vmor %vm1058_vm13, %vm1059_vm12 }
 0x167   : > { %v1017_v58 = vmul.f32 %v3337_v44, %v1016_v54  ;;  %v1055_v63 = vsub.f32 1.0, %v1054_v56  ;;  %v2847_v54 = vld [vmem:[%s3980_s30 + $0xd8] sm:$0xf0]  ;;  %v3135_v56 = vld [vmem:[%s3980_s30 + $0xac] sm:$0xf0] }
 0x168   : > { %v1036_v60 = vmul.f32 %v3339_v49, %v1035_v26 }
 0x169   : > { %v1018_v62 = vadd.f32 %v3337_v44, %v1017_v58  ;;  %v1056_v12 = vmul.f32 %v3341_v53, %v1055_v63  ;;  %v2822_v58 = vor.u32 %v3135_v56, %v2821_v55 }
 0x16a   : > { %v1037_v1 = vadd.f32 %v3339_v49, %v1036_v60  ;;  %v2829_v60 = vld [vmem:[%s3980_s30 + $0xa8] sm:$0xf] }
 0x16b   : > { %v1022_v2 = vsel %vm1021_vm7, %v3337_v44, %v1018_v62  ;;  %v1057_v16 = vadd.f32 %v3341_v53, %v1056_v12  ;;  %v3139_v44 = vld [vmem:[%s3980_s30 + $0xcc] sm:$0xf0]  ;;  %v2826_v62 = vor.u32 %v3133_v57, %v2823_v59  ;;  %v2830_v63 = vor.u32 %v3136_v61, %v2829_v60  ;;  %v2759_v59 = vld [vmem:[%s3980_s30 + $0x30] sm:$0xf0] }
 0x16c   : > { %v1027_v6 = vsel %vm1024_vm8, %v1026_v0, %v1022_v2  ;;  %v1041_v8 = vsel %vm1040_vm9, %v3339_v49, %v1037_v1  ;;  %v2838_v47 = vor.u32 %v3139_v44, %v2837_v43  ;;  %v2845_v49 = vld [vmem:[%s3980_s30 + $0xc8] sm:$0xf]  ;;  %v3134_v0 = vld [vmem:[%s3980_s30 + $0xac] sm:$0xf]  ;;  %v2831_v1 = vld [vmem:[%s3980_s30 + $0xb8] sm:$0xf0] }
 0x16d   : > { %v1069_v10 = vmul.f32 %v3343_v5, %v1027_v6  ;;  %v1046_v11 = vsel %vm1043_vm10, %v1045_v4, %v1041_v8  ;;  %v1061_v20 = vsel %vm1060_vm14, %v3341_v53, %v1057_v16  ;;  %v2846_v52 = vor.u32 %v3140_v50, %v2845_v49  ;;  %v3138_v53 = vld [vmem:[%s3980_s30 + $0xcc] sm:$0xf]  ;;  %1633 = vmatpush.bf16.msrb.mxu1 %v2826_v62  ;;  %v3131_v4 = vld [vmem:[%s3980_s30 + $0x8c] sm:$0xf0]  ;;  %v3129_v5 = vld [vmem:[%s3980_s30 + $0x84] sm:$0xf] }
 0x16e   : > { %v1068_v13 = vmul.f32 %v1046_v11, %v749_v3  ;;  %v1066_v23 = vsel %vm1063_vm15, %v1065_v21, %v1061_v20  ;;  %v2850_v26 = vor.u32 %v3138_v53, %v2847_v54  ;;  %v2834_v2 = vor.u32 %v3134_v0, %v2831_v1  ;;  %v2807_v8 = vld [vmem:[%s3980_s30 + $0x90] sm:$0xf0]  ;;  %v1090_v16 = vld [vmem:[%s4354_s4 + $0x8] sm:$0xff]  ;;  %v2789_v21 = vld [vmem:[%s3980_s30 + $0x60] sm:$0xf] }
 0x16f   : > { %1645 = vmatpush.bf16.msrb.mxu2 %v2846_v52  ;;  %v2810_v11 = vor.u32 %v3129_v5, %v2807_v8  ;;  %v3121_v43 = vld [vmem:[%s3980_s30 + $0x44] sm:$0xf]  ;;  %v1092_v44 = vld [vmem:[%s4354_s4 + $0x18] sm:$0xff]  ;;  %v3124_v49 = vld [vmem:[%s3980_s30 + $0x54] sm:$0xf0] }
 0x170   : > { %v1070_v15 = vadd.f32 %v1069_v10, %v1068_v13  ;;  %1658 = vmatpush.bf16.msrb.mxu3 %v2850_v26  ;;  %v3132_v10 = vld [vmem:[%s3980_s30 + $0x94] sm:$0xf0]  ;;  %v3130_v13 = vld [vmem:[%s3980_s30 + $0x8c] sm:$0xf]  ;;  %v2782_v51 = vor.u32 %v3124_v49, %v2781_v48  ;;  %v2783_v53 = vld [vmem:[%s3980_s30 + $0x58] sm:$0xf0] }
 0x171   : > { %v2814_v12 = vor.u32 %v3132_v10, %v2813_v9  ;;  %v2818_v17 = vor.u32 %v3130_v13, %v2815_v14  ;;  %1634 = vmatpush.bf16.msrb.mxu1 %v2810_v11  ;;  %v3122_v52 = vld [vmem:[%s3980_s30 + $0x4c] sm:$0xf]  ;;  %v2757_v54 = vld [vmem:[%s3980_s30 + $0x20] sm:$0xf]  ;;  %v3119_v57 = vld [vmem:[%s3980_s30 + $0x2c] sm:$0xf0] }
 0x172   : > { %3344 = vtanh.f32 %v1070_v15  ;;  %v4298_v18 = vsel %vm4291_vm11, %v1070_v15, %v749_v3  ;;  %v2805_v3 = vld [vmem:[%s3980_s30 + $0x80] sm:$0xf]  ;;  %v1089_v15 = vld [vmem:[%s4354_s4] sm:$0xff]  ;;  %v2786_v56 = vor.u32 %v3122_v52, %v2783_v53  ;;  %v2765_v0 = vld [vmem:[%s3980_s30 + $0x28] sm:$0xf] }
 0x173   : > { %1646 = vmatpush.bf16.msrb.mxu2 %v2830_v63  ;;  %v2806_v6 = vor.u32 %v3131_v4, %v2805_v3  ;;  %v2758_v63 = vor.u32 %v3119_v57, %v2757_v54  ;;  %v3120_v1 = vld [vmem:[%s3980_s30 + $0x34] sm:$0xf0]  ;;  %v2767_v5 = vld [vmem:[%s3980_s30 + $0x38] sm:$0xf0]  ;;  %v3115_v8 = vld [vmem:[%s3980_s30 + $0xc] sm:$0xf0] }
 0x174   : > { %1659 = vmatpush.bf16.msrb.mxu3 %v2834_v2  ;;  %v3118_v2 = vld [vmem:[%s3980_s30 + $0x2c] sm:$0xf]  ;;  %v2766_v4 = vor.u32 %v3120_v1, %v2765_v0  ;;  %v3113_v11 = vld [vmem:[%s3980_s30 + $0x4] sm:$0xf] }
 0x175   : > { %v2770_v10 = vor.u32 %v3118_v2, %v2767_v5 }
 0x177   : > { %1647 = vmatpush.bf16.msrb.mxu2 %v2814_v12  ;;  %v2743_v12 = vld [vmem:[%s3980_s30 + $0x10] sm:$0xf0] }
 0x178   : > { %v3345_v22 = vpop.eup %3344  ;;  %1660 = vmatpush.bf16.msrb.mxu3 %v2818_v17  ;;  %v3114_v17 = vld [vmem:[%s3980_s30 + $0xc] sm:$0xf] }
 0x179   : > { %v1072_v24 = vmul.f32 %v3345_v22, %v1066_v23  ;;  %v3127_v22 = vld [vmem:[%s3980_s30 + $0x6c] sm:$0xf0]  ;;  %v3125_v23 = vld [vmem:[%s3980_s30 + $0x64] sm:$0xf] }
 0x17b   : > { %v1076_v25 = vsel %vm4291_vm11, %v1072_v24, 0.0  ;;  %v4310_v27 = vsel %vm4291_vm11, %v1072_v24, %v4122_v7  ;;  %v2854_v7 = vor.u32 %v3143_v30, %v2853_v29  ;;  %v2791_v29 = vld [vmem:[%s3980_s30 + $0x70] sm:$0xf0]  ;;  %v2797_v30 = vld [vmem:[%s3980_s30 + $0x68] sm:$0xf] }
 0x17c   : > { %1078 = vst [vmem:[%s1077_s18] sm:$0xff] %v1076_v25  ;;  %v1093_v28 = vpack.c.bf16 %v4310_v27, %v4310_v27  ;;  %v2798_v33 = vor.u32 %v3128_v32, %v2797_v30  ;;  %1661 = vmatpush.bf16.msrb.mxu3 %v2802_v40  ;;  %v1091_v32 = vld [vmem:[%s4354_s4 + $0x10] sm:$0xff]  ;;  %s3145_s18 = sshll.u32 %s1747_s9, 5  ;;  %s2104_s9 = sshll.u32 %s3982_s16, 4  ;;  %s4544_s9 = int_to_ptr.vmem [resolvable:$true] %s2104_s9 }
 0x17d   : > { %1618 = vmatpush.bf16.msrb.mxu0 %v2854_v7  ;;  %v2794_v7 = vor.u32 %v3125_v23, %v2791_v29  ;;  %v2751_v23 = vld [vmem:[%s3980_s30 + $0x18] sm:$0xf0]  ;;  %s1751_s14 = scalar_lea.vmem [#allocation4], %s3145_s18  ;;  %s2072_s18 = scalar_lea.vmem %s3982_s16, %s1746_s0 [#allocation11] }
 0x17e   : > { %1294 = vmatmul.bf16.vlgmr.msra.gmra.mxu0 %v1093_v28  ;;  %1307 = vmatmul.bf16.vlgmr.msra.gmra.mxu1 %v1093_v28 }
 0x17f   : > { %1320 = vmatmul.bf16.vlgmr.msra.gmra.mxu2 %v1093_v28  ;;  %1333 = vmatmul.bf16.vlgmr.msra.gmra.mxu3 %v1093_v28  ;;  %v2790_v28 = vor.u32 %v3127_v22, %v2789_v21  ;;  %v2746_v21 = vor.u32 %v3113_v11, %v2743_v12  ;;  %v2986_v12 = vld [vmem:[%s3980_s30 + $0xe0] sm:$0xf] }
 0x180   : > { %1635 = vmatpush.bf16.msrb.mxu1 %v2794_v7  ;;  %1648 = vmatpush.bf16.msrb.mxu2 %v2798_v33 }
 0x181   : > { %1619 = vmatpush.bf16.msrb.mxu0 %v2838_v47  ;;  %v2775_v47 = vld [vmem:[%s3980_s30 + $0x50] sm:$0xf0]  ;;  %1662 = vmatpush.bf16.msrb.mxu3 %v2786_v56 }
 0x182   : > { %v2778_v50 = vor.u32 %v3121_v43, %v2775_v47 }
 0x184   : > { %1636 = vmatpush.bf16.msrb.mxu1 %v2778_v50  ;;  %1649 = vmatpush.bf16.msrb.mxu2 %v2782_v51 }
 0x185   : > { %1620 = vmatpush.bf16.msrb.mxu0 %v2822_v58  ;;  %v3117_v58 = vld [vmem:[%s3980_s30 + $0x24] sm:$0xf]  ;;  %1663 = vmatpush.bf16.msrb.mxu3 %v2770_v10 }
 0x186   : > { %v2762_v3 = vor.u32 %v3117_v58, %v2759_v59 }
 0x188   : > { %1637 = vmatpush.bf16.msrb.mxu1 %v2762_v3  ;;  %1650 = vmatpush.bf16.msrb.mxu2 %v2766_v4 }
 0x189   : > { %1621 = vmatpush.bf16.msrb.mxu0 %v2806_v6  ;;  %v2741_v6 = vld [vmem:[%s3980_s30] sm:$0xf] }
 0x18a   : > { %v2742_v14 = vor.u32 %v3115_v8, %v2741_v6 }
 0x18c   : > { %1638 = vmatpush.bf16.msrb.mxu1 %v2746_v21  ;;  %v2996_v21 = vld [vmem:[%s3980_s30 + $0xf8] sm:$0xf0] }
 0x18d   : > { %1622 = vmatpush.bf16.msrb.mxu0 %v2790_v28 }
 0x191   : > { %1623 = vmatpush.bf16.msrb.mxu0 %v2774_v45 }
 0x195   : > { %1624 = vmatpush.bf16.msrb.mxu0 %v2758_v63 }
 0x199   : > { %1625 = vmatpush.bf16.msrb.mxu0 %v2742_v14  ;;  %v2988_v14 = vld [vmem:[%s3980_s30 + $0xf0] sm:$0xf0] }
 0x1fb   : > { %v1295_v19 = vpop.f32.mrf.mxu0  ;;  %v1308_v20 = vpop.f32.mrf.mxu1 }
 0x1fc   : > { %v1338_v24 = vadd.f32 %v1295_v19, %v1089_v15  ;;  %v1339_v25 = vadd.f32 %v1308_v20, %v1090_v16  ;;  %v2749_v15 = vld [vmem:[%s3980_s30 + $0x8] sm:$0xf]  ;;  %v3116_v16 = vld [vmem:[%s3980_s30 + $0x14] sm:$0xf0] }
 0x1fd   : > { %v2750_v22 = vor.u32 %v3116_v16, %v2749_v15  ;;  %v2994_v15 = vld [vmem:[%s3980_s30 + $0xe8] sm:$0xf]  ;;  %v3177_v16 = vld [vmem:[%s3980_s30 + $0xf4] sm:$0xf0] }
 0x1fe   : > { %v2732_v37 = vmul.f32 -1.442695, %v1338_v24  ;;  %v2733_v38 = vmul.f32 -1.442695, %v1339_v25  ;;  %v2754_v25 = vor.u32 %v3114_v17, %v2751_v23  ;;  %v2970_v23 = vld [vmem:[%s3980_s30 + $0xc0] sm:$0xf] }
 0x1ff   : > { %1651 = vmatpush.bf16.msrb.mxu2 %v2750_v22 }
 0x200   : > { %3346 = vpow2.f32 %v2732_v37  ;;  %1664 = vmatpush.bf16.msrb.mxu3 %v2754_v25  ;;  %v3170_v25 = vld [vmem:[%s3980_s30 + $0xc4] sm:$0xf] }
 0x201   : > { %3348 = vpow2.f32 %v2733_v38 }
 0x202   : > { %v1321_v26 = vpop.f32.mrf.mxu2  ;;  %v1334_v55 = vpop.f32.mrf.mxu3 }
 0x203   : > { %v1341_v60 = vadd.f32 %v1334_v55, %v1092_v44  ;;  %v1297_v61 = vpop.f32.mrf.mxu0  ;;  %v1310_v62 = vpop.f32.mrf.mxu1  ;;  %v1340_v34 = vadd.f32 %v1321_v26, %v1091_v32  ;;  %v3173_v32 = vld [vmem:[%s3980_s30 + $0xd4] sm:$0xf0] }
 0x205   : > { %v2734_v9 = vmul.f32 -1.442695, %v1341_v60 }
 0x206   : > { %v3347_v13 = vpop.eup %3346 }
 0x207   : > { %v3349_v19 = vpop.eup %3348  ;;  %v1345_v20 = vadd.f32 1.0, %v3347_v13  ;;  %3350 = vpow2.f32 %v2734_v9  ;;  %v2987_v13 = vor.u32 %v3176_v31, %v2986_v12  ;;  %v2924_v12 = vld [vmem:[%s3980_s30 + $0x70] sm:$0xf0]  ;;  %v1424_v31 = vld [vmem:[%s4445_s12 + $0x18] sm:$0xff] }
 0x208   : > { %v1364_v24 = vadd.f32 1.0, %v3349_v19  ;;  %v2995_v19 = vor.u32 %v3177_v16, %v2994_v15  ;;  %v3161_v15 = vld [vmem:[%s3980_s30 + $0x74] sm:$0xf0]  ;;  %v3159_v16 = vld [vmem:[%s3980_s30 + $0x6c] sm:$0xf] }
 0x209   : > { %3352 = vrcp.f32 %v1345_v20  ;;  %v1357_v42 = vand.u32 2147483648, %v1345_v20  ;;  %v1355_v45 = vand.u32 2147483647, %v1345_v20  ;;  %vm1351_vm5 = vweird.f32 %v1345_v20  ;;  %1949 = vmatpush.bf16.msra.mxu0 %v2987_v13 }
 0x20a   : > { %3354 = vrcp.f32 %v1364_v24  ;;  %v1323_v28 = vpop.f32.mrf.mxu2  ;;  %v1336_v29 = vpop.f32.mrf.mxu3  ;;  %v1376_v43 = vand.u32 2147483648, %v1364_v24  ;;  %v1374_v48 = vand.u32 2147483647, %v1364_v24  ;;  %vm1370_vm6 = vweird.f32 %v1364_v24  ;;  %1975 = vmatpush.bf16.msra.mxu2 %v2995_v19  ;;  %v2932_v19 = vld [vmem:[%s3980_s30 + $0x78] sm:$0xf0] }
 0x20b   : > { %v1358_v51 = vor.u32 1.1754944e-38, %v1357_v42  ;;  %vm1356_vm9 = vcmp.eq.f32.partialorder %v1355_v45, 8.507059e+37  ;;  %v2972_v29 = vld [vmem:[%s3980_s30 + $0xd0] sm:$0xf0]  ;;  %v3169_v45 = vld [vmem:[%s3980_s30 + $0xb4] sm:$0xf0] }
 0x20c   : > { %v1377_v54 = vor.u32 1.1754944e-38, %v1376_v43  ;;  %vm1375_vm10 = vcmp.eq.f32.partialorder %v1374_v48, 8.507059e+37  ;;  %v2956_v43 = vld [vmem:[%s3980_s30 + $0xb0] sm:$0xf0] }
 0x20d   : > { %v3351_v30 = vpop.eup %3350 }
 0x20e   : > { %v1384_v7 = vadd.f32 1.0, %v3351_v30  ;;  %v2978_v30 = vld [vmem:[%s3980_s30 + $0xc8] sm:$0xf] }
 0x20f   : > { %v3353_v33 = vpop.eup %3352 }
 0x210   : > { %v3355_v36 = vpop.eup %3354  ;;  %v1347_v37 = vmul.f32 %v3353_v33, %v1345_v20  ;;  %3356 = vrcp.f32 %v1384_v7  ;;  %vm1352_vm3 = vweird.f32 %v3353_v33  ;;  %v1396_v1 = vand.u32 2147483648, %v1384_v7  ;;  %v3175_v20 = vld [vmem:[%s3980_s30 + $0xec] sm:$0xf] }
 0x211   : > { %v1366_v38 = vmul.f32 %v3355_v36, %v1364_v24  ;;  %3358 = vtanh.f32 %v1340_v34  ;;  %vm1371_vm4 = vweird.f32 %v3355_v36  ;;  %vm1353_vm7 = vmor %vm1351_vm5, %vm1352_vm3  ;;  %vm1390_vm12 = vweird.f32 %v1384_v7  ;;  %v3172_v24 = vld [vmem:[%s3980_s30 + $0xcc] sm:$0xf0]  ;;  %v3171_v34 = vld [vmem:[%s3980_s30 + $0xcc] sm:$0xf] }
 0x212   : > { %v1348_v40 = vsub.f32 1.0, %v1347_v37  ;;  %vm1372_vm8 = vmor %vm1370_vm6, %vm1371_vm4  ;;  %v1394_v3 = vand.u32 2147483647, %v1384_v7  ;;  %v1397_v5 = vor.u32 1.1754944e-38, %v1396_v1  ;;  %v2999_v22 = vor.u32 %v3175_v20, %v2996_v21  ;;  %v2906_v20 = vld [vmem:[%s3980_s30 + $0x40] sm:$0xf] }
 0x213   : > { %v1367_v41 = vsub.f32 1.0, %v1366_v38  ;;  %v2971_v28 = vor.u32 %v3172_v24, %v2970_v23  ;;  %v2954_v38 = vld [vmem:[%s3980_s30 + $0xa0] sm:$0xf]  ;;  %v3156_v21 = vld [vmem:[%s3980_s30 + $0x4c] sm:$0xf0]  ;;  %v2935_v24 = vor.u32 %v3159_v16, %v2932_v19 }
 0x214   : > { %v1349_v44 = vmul.f32 %v3353_v33, %v1348_v40  ;;  %vm1395_vm14 = vcmp.eq.f32.partialorder %v1394_v3, 8.507059e+37  ;;  %1988 = vmatpush.bf16.msra.mxu3 %v2999_v22  ;;  %v3168_v40 = vld [vmem:[%s3980_s30 + $0xac] sm:$0xf0]  ;;  %v3163_v3 = vld [vmem:[%s3980_s30 + $0x8c] sm:$0xf] }
 0x215   : > { %v1368_v47 = vmul.f32 %v3355_v36, %v1367_v41  ;;  %1950 = vmatpush.bf16.msra.mxu0 %v2971_v28  ;;  %v3166_v41 = vld [vmem:[%s3980_s30 + $0xa4] sm:$0xf]  ;;  %v2955_v42 = vor.u32 %v3168_v40, %v2954_v38  ;;  %v2916_v38 = vld [vmem:[%s3980_s30 + $0x58] sm:$0xf0] }
 0x216   : > { %v3357_v49 = vpop.eup %3356  ;;  %v1350_v50 = vadd.f32 %v3353_v33, %v1349_v44  ;;  %v2962_v44 = vld [vmem:[%s3980_s30 + $0xa8] sm:$0xf]  ;;  %v3154_v28 = vld [vmem:[%s3980_s30 + $0x44] sm:$0xf] }
 0x217   : > { %v1369_v52 = vadd.f32 %v3355_v36, %v1368_v47  ;;  %v1386_v53 = vmul.f32 %v3357_v49, %v1384_v7  ;;  %v3359_v55 = vpop.eup %3358  ;;  %vm1391_vm11 = vweird.f32 %v3357_v49  ;;  %v2975_v7 = vor.u32 %v3170_v25, %v2972_v29  ;;  %v2908_v29 = vld [vmem:[%s3980_s30 + $0x50] sm:$0xf0] }
 0x218   : > { %v1354_v26 = vsel %vm1353_vm7, %v3353_v33, %v1350_v50  ;;  %vm1392_vm13 = vmor %vm1390_vm12, %vm1391_vm11  ;;  %v2979_v33 = vor.u32 %v3173_v32, %v2978_v30  ;;  %v2959_v47 = vor.u32 %v3166_v41, %v2956_v43  ;;  %v2963_v48 = vor.u32 %v3169_v45, %v2962_v44  ;;  %v2964_v50 = vld [vmem:[%s3980_s30 + $0xb8] sm:$0xf0]  ;;  %v2914_v30 = vld [vmem:[%s3980_s30 + $0x48] sm:$0xf] }
 0x219   : > { %v1359_v56 = vsel %vm1356_vm9, %v1358_v51, %v1354_v26  ;;  %v1373_v57 = vsel %vm1372_vm8, %v3355_v36, %v1369_v52  ;;  %v1387_v58 = vsub.f32 1.0, %v1386_v53  ;;  %v2980_v36 = vld [vmem:[%s3980_s30 + $0xd8] sm:$0xf0]  ;;  %v1421_v51 = vld [vmem:[%s4445_s12] sm:$0xff]  ;;  %1951 = vmatpush.bf16.msra.mxu0 %v2955_v42  ;;  %v2907_v25 = vor.u32 %v3156_v21, %v2906_v20  ;;  %v2890_v42 = vld [vmem:[%s3980_s30 + $0x20] sm:$0xf] }
 0x21a   : > { %v1378_v59 = vsel %vm1375_vm10, %v1377_v54, %v1373_v57  ;;  %v1401_v60 = vmul.f32 %v3359_v55, %v1359_v56  ;;  %v2983_v37 = vor.u32 %v3171_v34, %v2980_v36  ;;  %1976 = vmatpush.bf16.msra.mxu2 %v2979_v33  ;;  %v1422_v52 = vld [vmem:[%s4445_s12 + $0x8] sm:$0xff]  ;;  %v2938_v54 = vld [vmem:[%s3980_s30 + $0x80] sm:$0xf]  ;;  %v3164_v26 = vld [vmem:[%s3980_s30 + $0x8c] sm:$0xf0]  ;;  %v2911_v34 = vor.u32 %v3154_v28, %v2908_v29 }
 0x21b   : > { %v1400_v61 = vmul.f32 %v1378_v59, %v4298_v18  ;;  %v1388_v62 = vmul.f32 %v3357_v49, %v1387_v58  ;;  %v3162_v55 = vld [vmem:[%s3980_s30 + $0x84] sm:$0xf]  ;;  %v2939_v58 = vor.u32 %v3164_v26, %v2938_v54  ;;  %v2940_v59 = vld [vmem:[%s3980_s30 + $0x90] sm:$0xf0]  ;;  %v3157_v36 = vld [vmem:[%s3980_s30 + $0x54] sm:$0xf0] }
 0x21c   : > { %1989 = vmatpush.bf16.msra.mxu3 %v2983_v37  ;;  %v3155_v37 = vld [vmem:[%s3980_s30 + $0x4c] sm:$0xf]  ;;  %v2915_v40 = vor.u32 %v3157_v36, %v2914_v30  ;;  %v3152_v43 = vld [vmem:[%s3980_s30 + $0x2c] sm:$0xf0]  ;;  %v3150_v44 = vld [vmem:[%s3980_s30 + $0x24] sm:$0xf] }
 0x21d   : > { %v1402_v63 = vadd.f32 %v1401_v60, %v1400_v61  ;;  %v1389_v0 = vadd.f32 %v3357_v49, %v1388_v62  ;;  %v2946_v60 = vld [vmem:[%s3980_s30 + $0x88] sm:$0xf]  ;;  %v3165_v61 = vld [vmem:[%s3980_s30 + $0x94] sm:$0xf0]  ;;  %1952 = vmatpush.bf16.msra.mxu0 %v2939_v58  ;;  %v2919_v41 = vor.u32 %v3155_v37, %v2916_v38  ;;  %v2900_v54 = vld [vmem:[%s3980_s30 + $0x38] sm:$0xf0] }
 0x21e   : > { %1977 = vmatpush.bf16.msra.mxu2 %v2963_v48  ;;  %v2947_v1 = vor.u32 %v3165_v61, %v2946_v60  ;;  %v2898_v48 = vld [vmem:[%s3980_s30 + $0x28] sm:$0xf]  ;;  %v3148_v58 = vld [vmem:[%s3980_s30 + $0xc] sm:$0xf0]  ;;  %v3146_v61 = vld [vmem:[%s3980_s30 + $0x4] sm:$0xf] }
 0x21f   : > { %3360 = vtanh.f32 %v1402_v63  ;;  %v4397_v2 = vsel %vm1407_vm0, %v1402_v63, %v4298_v18  ;;  %v1393_v4 = vsel %vm1392_vm13, %v3357_v49, %v1389_v0  ;;  %v3167_v49 = vld [vmem:[%s3980_s30 + $0xac] sm:$0xf]  ;;  %v2943_v0 = vor.u32 %v3162_v55, %v2940_v59 }
 0x220   : > { %v1398_v8 = vsel %vm1395_vm14, %v1397_v5, %v1393_v4  ;;  %v2967_v53 = vor.u32 %v3167_v49, %v2964_v50  ;;  %v2948_v4 = vld [vmem:[%s3980_s30 + $0x98] sm:$0xf0]  ;;  %v2891_v50 = vor.u32 %v3152_v43, %v2890_v42 }
 0x221   : > { %v2951_v5 = vor.u32 %v3163_v3, %v2948_v4  ;;  %v3149_v4 = vld [vmem:[%s3980_s30 + $0x14] sm:$0xf0] }
 0x222   : > { %1990 = vmatpush.bf16.msra.mxu3 %v2967_v53  ;;  %1978 = vmatpush.bf16.msra.mxu2 %v2947_v1  ;;  %v3151_v53 = vld [vmem:[%s3980_s30 + $0x2c] sm:$0xf] }
 0x223   : > { %v2903_v60 = vor.u32 %v3151_v53, %v2900_v54 }
 0x225   : > { %v3361_v6 = vpop.eup %3360 }
 0x226   : > { %v1404_v9 = vmul.f32 %v3361_v6, %v1398_v8  ;;  %1991 = vmatpush.bf16.msra.mxu3 %v2951_v5 }
 0x228   : > { %v1408_v18 = vsel %vm1407_vm0, %v1404_v9, 0.0  ;;  %v4409_v10 = vsel %vm1407_vm0, %v1404_v9, %v4310_v27  ;;  %v3174_v27 = vld [vmem:[%s3980_s30 + $0xe4] sm:$0xf]  ;;  %v2922_v9 = vld [vmem:[%s3980_s30 + $0x60] sm:$0xf] }
 0x229   : > { %1410 = vst [vmem:[%s1409_s11] sm:$0xff] %v1408_v18  ;;  %v1425_v11 = vpack.c.bf16 %v4409_v10, %v4409_v10  ;;  %v2991_v17 = vor.u32 %v3174_v27, %v2988_v14  ;;  %v3160_v18 = vld [vmem:[%s3980_s30 + $0x6c] sm:$0xf0]  ;;  %v2930_v14 = vld [vmem:[%s3980_s30 + $0x68] sm:$0xf] }
 0x22a   : > { %v2923_v27 = vor.u32 %v3160_v18, %v2922_v9  ;;  %1992 = vmatpush.bf16.msra.mxu3 %v2935_v24  ;;  %v2884_v9 = vld [vmem:[%s3980_s30 + $0x18] sm:$0xf0] }
 0x22b   : > { %1626 = vmatmul.bf16.vlgmr.msrb.gmra.mxu0 %v1425_v11  ;;  %1639 = vmatmul.bf16.vlgmr.msrb.gmra.mxu1 %v1425_v11 }
 0x22c   : > { %1652 = vmatmul.bf16.vlgmr.msrb.gmra.mxu2 %v1425_v11  ;;  %1665 = vmatmul.bf16.vlgmr.msrb.gmra.mxu3 %v1425_v11  ;;  %v3158_v11 = vld [vmem:[%s3980_s30 + $0x64] sm:$0xf] }
 0x22d   : > { %1962 = vmatpush.bf16.msra.mxu1 %v2991_v17  ;;  %v2927_v13 = vor.u32 %v3158_v11, %v2924_v12  ;;  %v2931_v17 = vor.u32 %v3161_v15, %v2930_v14  ;;  %1953 = vmatpush.bf16.msra.mxu0 %v2923_v27  ;;  %v1423_v12 = vld [vmem:[%s4445_s12 + $0x10] sm:$0xff]  ;;  %s3008_s12 = sshll.u32 %s4723_s7, 3  ;;  %s2121_s7 = sshll.u32 %s3984_s24, 4  ;;  %s4552_s7 = int_to_ptr.vmem [resolvable:$true] %s2121_s7 }
 0x22e   : > { %1993 = vmatpush.bf16.msra.mxu3 %v2919_v41 }
 0x22f   : > { %1979 = vmatpush.bf16.msra.mxu2 %v2931_v17 }
 0x231   : > { %1963 = vmatpush.bf16.msra.mxu1 %v2975_v7  ;;  %1954 = vmatpush.bf16.msra.mxu0 %v2907_v25 }
 0x232   : > { %1994 = vmatpush.bf16.msra.mxu3 %v2903_v60 }
 0x233   : > { %1980 = vmatpush.bf16.msra.mxu2 %v2915_v40 }
 0x235   : > { %1964 = vmatpush.bf16.msra.mxu1 %v2959_v47  ;;  %v2892_v47 = vld [vmem:[%s3980_s30 + $0x30] sm:$0xf0]  ;;  %1955 = vmatpush.bf16.msra.mxu0 %v2891_v50 }
 0x239   : > { %1965 = vmatpush.bf16.msra.mxu1 %v2943_v0 }
 0x23d   : > { %1966 = vmatpush.bf16.msra.mxu1 %v2927_v13 }
 0x241   : > { %1967 = vmatpush.bf16.msra.mxu1 %v2911_v34 }
 0x2a8   : > { %v1627_v56 = vpop.f32.mrf.mxu0  ;;  %v1640_v57 = vpop.f32.mrf.mxu1 }
 0x2a9   : > { %v1670_v62 = vadd.f32 %v1627_v56, %v1421_v51  ;;  %v1671_v63 = vadd.f32 %v1640_v57, %v1422_v52  ;;  %v2895_v51 = vor.u32 %v3150_v44, %v2892_v47  ;;  %v3153_v52 = vld [vmem:[%s3980_s30 + $0x34] sm:$0xf0]  ;;  %v2874_v57 = vld [vmem:[%s3980_s30] sm:$0xf] }
 0x2aa   : > { %v2899_v56 = vor.u32 %v3153_v52, %v2898_v48  ;;  %v2875_v3 = vor.u32 %v3148_v58, %v2874_v57  ;;  %v1752_v57 = vld [vmem:[%s1751_s14] sm:$0xff] }
 0x2ab   : > { %v2867_v6 = vmul.f32 -1.442695, %v1670_v62  ;;  %v2868_v8 = vmul.f32 -1.442695, %v1671_v63  ;;  %v2876_v62 = vld [vmem:[%s3980_s30 + $0x10] sm:$0xf0]  ;;  %1968 = vmatpush.bf16.msra.mxu1 %v2895_v51 }
 0x2ac   : > { %v2882_v63 = vld [vmem:[%s3980_s30 + $0x8] sm:$0xf]  ;;  %1981 = vmatpush.bf16.msra.mxu2 %v2899_v56  ;;  %v2879_v5 = vor.u32 %v3146_v61, %v2876_v62  ;;  %1956 = vmatpush.bf16.msra.mxu0 %v2875_v3 }
 0x2ad   : > { %3362 = vpow2.f32 %v2867_v6  ;;  %v2883_v6 = vor.u32 %v3149_v4, %v2882_v63  ;;  %v1755_v63 = vld [vmem:[%s1751_s14 + $0x18] sm:$0xff] }
 0x2ae   : > { %3364 = vpow2.f32 %v2868_v8  ;;  %v3147_v8 = vld [vmem:[%s3980_s30 + $0xc] sm:$0xf]  ;;  %s1741_s30 = scalar_lea.vmem %s3982_s16, %s2736_s25 [#allocation11]  ;;  %s4728_s25 = sld [smem:[#allocation37_spill]] }
 0x2af   : > { %v4468_v22 = vpop.f32.mrf.mxu2  ;;  %v1666_v23 = vpop.f32.mrf.mxu3  ;;  %v2887_v18 = vor.u32 %v3147_v8, %v2884_v9  ;;  %1969 = vmatpush.bf16.msra.mxu1 %v2879_v5  ;;  %s2080_s16 = scalar_lea.sflag [#allocation7], %s406_s17 }
 0x2b0   : > { %v1673_v32 = vadd.f32 %v1666_v23, %v1424_v31  ;;  %v1629_v7 = vpop.f32.mrf.mxu0  ;;  %v1642_v33 = vpop.f32.mrf.mxu1  ;;  %v1672_v13 = vadd.f32 %v4468_v22, %v1423_v12  ;;  %1982 = vmatpush.bf16.msra.mxu2 %v2883_v6 }
 0x2b1   : > { %1995 = vmatpush.bf16.msra.mxu3 %v2887_v18 }
 0x2b2   : > { %v2869_v45 = vmul.f32 -1.442695, %v1673_v32 }
 0x2b3   : > { %v3363_v49 = vpop.eup %3362 }
 0x2b4   : > { %v3365_v26 = vpop.eup %3364  ;;  %v4484_v55 = vadd.f32 1.0, %v3363_v49  ;;  %3366 = vpow2.f32 %v2869_v45  ;;  %s4729_s3 = smov %s4728_s25  ;;  %s2103_s13 = scalar_lea.hbm %s4728_s25, %s3007_s2 }
 0x2b5   : > { %v1696_v59 = vadd.f32 1.0, %v3365_v26  ;;  %s2119_s2 = scalar_lea.hbm %s4730_s15, %s3008_s12 }
 0x2b6   : > { %3368 = vrcp.f32 %v4484_v55  ;;  %v1689_v20 = vand.u32 2147483648, %v4484_v55  ;;  %v1687_v24 = vand.u32 2147483647, %v4484_v55  ;;  %vm1683_vm3 = vweird.f32 %v4484_v55  ;;  %s2123_s4 = sshll.u32 %s2119_s2, 4  ;;  %s4554_s4 = int_to_ptr.hbm [resolvable:$true] %s2123_s4 }
 0x2b7   : > { %3370 = vrcp.f32 %v1696_v59  ;;  %v1655_v0 = vpop.f32.mrf.mxu2  ;;  %v1668_v1 = vpop.f32.mrf.mxu3  ;;  %v1708_v21 = vand.u32 2147483648, %v1696_v59  ;;  %v1706_v22 = vand.u32 2147483647, %v1696_v59  ;;  %vm1702_vm4 = vweird.f32 %v1696_v59 }
 0x2b8   : > { %v1690_v30 = vor.u32 1.1754944e-38, %v1689_v20  ;;  %vm1688_vm7 = vcmp.eq.f32.partialorder %v1687_v24, 8.507059e+37 }
 0x2b9   : > { %v1709_v33 = vor.u32 1.1754944e-38, %v1708_v21  ;;  %vm1707_vm8 = vcmp.eq.f32.partialorder %v1706_v22, 8.507059e+37 }
 0x2ba   : > { %v3367_v11 = vpop.eup %3366 }
 0x2bb   : > { %v1716_v31 = vadd.f32 1.0, %v3367_v11 }
 0x2bc   : > { %v3369_v27 = vpop.eup %3368 }
 0x2bd   : > { %v3371_v14 = vpop.eup %3370  ;;  %v1679_v15 = vmul.f32 %v3369_v27, %v4484_v55  ;;  %3372 = vrcp.f32 %v1716_v31  ;;  %vm1684_vm0 = vweird.f32 %v3369_v27  ;;  %v1728_v48 = vand.u32 2147483648, %v1716_v31 }
 0x2be   : > { %v1698_v16 = vmul.f32 %v3371_v14, %v1696_v59  ;;  %3374 = vtanh.f32 %v1672_v13  ;;  %vm1703_vm15 = vweird.f32 %v3371_v14  ;;  %vm1685_vm5 = vmor %vm1683_vm3, %vm1684_vm0  ;;  %vm1722_vm10 = vweird.f32 %v1716_v31  ;;  %v1753_v59 = vld [vmem:[%s1751_s14 + $0x8] sm:$0xff] }
 0x2bf   : > { %v1680_v17 = vsub.f32 1.0, %v1679_v15  ;;  %vm1704_vm6 = vmor %vm1702_vm4, %vm1703_vm15  ;;  %v1726_v50 = vand.u32 2147483647, %v1716_v31  ;;  %v1729_v52 = vor.u32 1.1754944e-38, %v1728_v48 }
 0x2c0   : > { %v1699_v19 = vsub.f32 1.0, %v1698_v16 }
 0x2c1   : > { %v1681_v23 = vmul.f32 %v3369_v27, %v1680_v17  ;;  %vm1727_vm12 = vcmp.eq.f32.partialorder %v1726_v50, 8.507059e+37 }
 0x2c2   : > { %v1700_v25 = vmul.f32 %v3371_v14, %v1699_v19 }
 0x2c3   : > { %v3373_v28 = vpop.eup %3372  ;;  %v1682_v29 = vadd.f32 %v3369_v27, %v1681_v23 }
 0x2c4   : > { %v1701_v32 = vadd.f32 %v3371_v14, %v1700_v25  ;;  %v1718_v7 = vmul.f32 %v3373_v28, %v1716_v31  ;;  %v3375_v36 = vpop.eup %3374  ;;  %vm1723_vm9 = vweird.f32 %v3373_v28 }
 0x2c5   : > { %v1686_v34 = vsel %vm1685_vm5, %v3369_v27, %v1682_v29  ;;  %vm1724_vm11 = vmor %vm1722_vm10, %vm1723_vm9  ;;  %v1754_v27 = vld [vmem:[%s1751_s14 + $0x10] sm:$0xff] }
 0x2c6   : > { %v1691_v37 = vsel %vm1688_vm7, %v1690_v30, %v1686_v34  ;;  %v1705_v38 = vsel %vm1704_vm6, %v3371_v14, %v1701_v32  ;;  %v1719_v40 = vsub.f32 1.0, %v1718_v7 }
 0x2c7   : > { %v1710_v41 = vsel %vm1707_vm8, %v1709_v33, %v1705_v38  ;;  %v1733_v42 = vmul.f32 %v3375_v36, %v1691_v37 }
 0x2c8   : > { %v1732_v43 = vmul.f32 %v1710_v41, %v4397_v2  ;;  %v1720_v44 = vmul.f32 %v3373_v28, %v1719_v40 }
 0x2ca   : > { %v1734_v45 = vadd.f32 %v1733_v42, %v1732_v43  ;;  %v1721_v47 = vadd.f32 %v3373_v28, %v1720_v44 }
 0x2cc   : > { %3376 = vtanh.f32 %v1734_v45  ;;  %v4506_v49 = vsel %vm1739_vm1, %v1734_v45, %v4397_v2  ;;  %v1725_v51 = vsel %vm1724_vm11, %v3373_v28, %v1721_v47 }
 0x2cd   : > { %v1730_v54 = vsel %vm1727_vm12, %v1729_v52, %v1725_v51 }
 0x2d2   : > { %v3377_v53 = vpop.eup %3376 }
 0x2d3   : > { %v1736_v26 = vmul.f32 %v3377_v53, %v1730_v54 }
 0x2d5   : > { %v1740_v55 = vsel %vm1739_vm1, %v1736_v26, 0.0  ;;  %v4518_v2 = vsel %vm1739_vm1, %v1736_v26, %v4409_v10 }
 0x2d6   : > { %1742 = vst [vmem:[%s1741_s30] sm:$0xff] %v1740_v55  ;;  %v1756_v56 = vpack.c.bf16 %v4518_v2, %v4518_v2  ;;  %s2106_s30 = sshll.u32 %s2103_s13, 4  ;;  %s3504_s13 = scalar_lea.hbm %s4729_s3, 128  ;;  %s4542_s30 = int_to_ptr.hbm [resolvable:$true] %s2106_s30 }
 0x2d7   : > { %s3498_s6 = sshra.s32 %s4542_s30, 4  ;;  %s3499_s6 = int_to_ptr.hbm [resolvable:$true] %s3498_s6 }
 0x2d8   : > { %1957 = vmatmul.bf16.vlgmr.msra.gmra.mxu0 %v1756_v56  ;;  %1970 = vmatmul.bf16.vlgmr.msra.gmra.mxu1 %v1756_v56  ;;  %s3500_s0 = scalar_lea.hbm %s3499_s6, 32  ;;  %p3505_p0 = scmp.lt.s32.totalorder %s3499_s6, %s4729_s3 }
 0x2d9   : > { %1983 = vmatmul.bf16.vlgmr.msra.gmra.mxu2 %v1756_v56  ;;  %1996 = vmatmul.bf16.vlgmr.msra.gmra.mxu3 %v1756_v56  ;;  %p3501_p11 = scmp.ne.s32.totalorder %s3499_s6, %s3500_s0  ;;  %p3506_p4 = scmp.lt.s32.totalorder %s3504_s13, %s3500_s0 }
 0x2db   : > { %p3502_p2 = pnand %p3501_p11, %p3912_p3  ;;  %p3507_p10 = por %p3506_p4, %p3505_p0 }
 0x2dd   : > { %p3503_p13 = pneg %p3502_p2 }
 0x2df   : > { %p3508_p6 = pnand %p3507_p10, %p3503_p13 }
 0x355   : > { %v1958_v58 = vpop.f32.mrf.mxu0  ;;  %v1971_v60 = vpop.f32.mrf.mxu1 }
 0x356   : > { %v2001_v35 = vadd.f32 %v1958_v58, %v1752_v57  ;;  %v2002_v39 = vadd.f32 %v1971_v60, %v1753_v59 }
 0x358   : > { %v3000_v10 = vmul.f32 -1.442695, %v2001_v35  ;;  %v3001_v61 = vmul.f32 -1.442695, %v2002_v39 }
 0x35a   : > { %3378 = vpow2.f32 %v3000_v10 }
 0x35b   : > { %3380 = vpow2.f32 %v3001_v61 }
 0x35c   : > { %v1984_v62 = vpop.f32.mrf.mxu2  ;;  %v1997_v0 = vpop.f32.mrf.mxu3 }
 0x35d   : > { %v2004_v1 = vadd.f32 %v1997_v0, %v1755_v63  ;;  %v1960_v3 = vpop.f32.mrf.mxu0  ;;  %v1973_v4 = vpop.f32.mrf.mxu1  ;;  %v2003_v15 = vadd.f32 %v1984_v62, %v1754_v27 }
 0x35f   : > { %v3002_v5 = vmul.f32 -1.442695, %v2004_v1 }
 0x360   : > { %v3379_v6 = vpop.eup %3378 }
 0x361   : > { %v3381_v8 = vpop.eup %3380  ;;  %v2008_v9 = vadd.f32 1.0, %v3379_v6  ;;  %3382 = vpow2.f32 %v3002_v5 }
 0x362   : > { %v2027_v18 = vadd.f32 1.0, %v3381_v8 }
 0x363   : > { %3384 = vrcp.f32 %v2008_v9  ;;  %v2020_v23 = vand.u32 2147483648, %v2008_v9  ;;  %v2018_v22 = vand.u32 2147483647, %v2008_v9  ;;  %vm2014_vm14 = vweird.f32 %v2008_v9 }
 0x364   : > { %3386 = vrcp.f32 %v2027_v18  ;;  %v1986_v11 = vpop.f32.mrf.mxu2  ;;  %v1999_v12 = vpop.f32.mrf.mxu3  ;;  %v2039_v24 = vand.u32 2147483648, %v2027_v18  ;;  %v2037_v29 = vand.u32 2147483647, %v2027_v18  ;;  %vm2033_vm0 = vweird.f32 %v2027_v18 }
 0x365   : > { %v2021_v7 = vor.u32 1.1754944e-38, %v2020_v23  ;;  %vm2019_vm4 = vcmp.eq.f32.partialorder %v2018_v22, 8.507059e+37 }
 0x366   : > { %v2040_v36 = vor.u32 1.1754944e-38, %v2039_v24  ;;  %vm2038_vm5 = vcmp.eq.f32.partialorder %v2037_v29, 8.507059e+37 }
 0x367   : > { %v3383_v31 = vpop.eup %3382 }
 0x368   : > { %v2047_v13 = vadd.f32 1.0, %v3383_v31 }
 0x369   : > { %v3385_v14 = vpop.eup %3384 }
 0x36a   : > { %v3387_v16 = vpop.eup %3386  ;;  %v2010_v17 = vmul.f32 %v3385_v14, %v2008_v9  ;;  %3388 = vrcp.f32 %v2047_v13  ;;  %vm2015_vm1 = vweird.f32 %v3385_v14  ;;  %v2059_v52 = vand.u32 2147483648, %v2047_v13 }
 0x36b   : > { %v2029_v19 = vmul.f32 %v3387_v16, %v2027_v18  ;;  %3390 = vtanh.f32 %v2003_v15  ;;  %vm2034_vm13 = vweird.f32 %v3387_v16  ;;  %vm2016_vm15 = vmor %vm2014_vm14, %vm2015_vm1  ;;  %vm2053_vm7 = vweird.f32 %v2047_v13 }
 0x36c   : > { %v2011_v20 = vsub.f32 1.0, %v2010_v17  ;;  %vm2035_vm3 = vmor %vm2033_vm0, %vm2034_vm13  ;;  %v2057_v53 = vand.u32 2147483647, %v2047_v13  ;;  %v2060_v26 = vor.u32 1.1754944e-38, %v2059_v52 }
 0x36d   : > { %v2030_v21 = vsub.f32 1.0, %v2029_v19 }
 0x36e   : > { %v2012_v25 = vmul.f32 %v3385_v14, %v2011_v20  ;;  %vm2058_vm9 = vcmp.eq.f32.partialorder %v2057_v53, 8.507059e+37 }
 0x36f   : > { %v2031_v28 = vmul.f32 %v3387_v16, %v2030_v21 }
 0x370   : > { %v3389_v30 = vpop.eup %3388  ;;  %v2013_v32 = vadd.f32 %v3385_v14, %v2012_v25 }
 0x371   : > { %v2032_v33 = vadd.f32 %v3387_v16, %v2031_v28  ;;  %v2049_v34 = vmul.f32 %v3389_v30, %v2047_v13  ;;  %v3391_v38 = vpop.eup %3390  ;;  %vm2054_vm6 = vweird.f32 %v3389_v30 }
 0x372   : > { %v2017_v37 = vsel %vm2016_vm15, %v3385_v14, %v2013_v32  ;;  %vm2055_vm8 = vmor %vm2053_vm7, %vm2054_vm6 }
 0x373   : > { %v2022_v40 = vsel %vm2019_vm4, %v2021_v7, %v2017_v37  ;;  %v2036_v41 = vsel %vm2035_vm3, %v3387_v16, %v2032_v33  ;;  %v2050_v42 = vsub.f32 1.0, %v2049_v34 }
 0x374   : > { %v2041_v43 = vsel %vm2038_vm5, %v2040_v36, %v2036_v41  ;;  %v2064_v44 = vmul.f32 %v3391_v38, %v2022_v40 }
 0x375   : > { %v2063_v45 = vmul.f32 %v2041_v43, %v4506_v49  ;;  %v2051_v47 = vmul.f32 %v3389_v30, %v2050_v42 }
 0x377   : > { %v2065_v48 = vadd.f32 %v2064_v44, %v2063_v45  ;;  %v2052_v50 = vadd.f32 %v3389_v30, %v2051_v47 }
 0x379   : > { %3392 = vtanh.f32 %v2065_v48  ;;  %v2075_v51 = vsel %vm4275_vm2, %v2065_v48, %v4506_v49  ;;  %v2056_v54 = vsel %vm2055_vm8, %v3389_v30, %v2052_v50 }
 0x37a   : > { %2077 = vst [vmem:[#allocation3] sm:$0xff] %v2075_v51  ;;  %v2061_v55 = vsel %vm2058_vm9, %v2060_v26, %v2056_v54 }
 0x37f   : > { %v3393_v49 = vpop.eup %3392 }
 0x380   : > { %v2067_v56 = vmul.f32 %v3393_v49, %v2061_v55 }
 0x382   : > { %v2071_v57 = vsel %vm4275_vm2, %v2067_v56, 0.0  ;;  %v2074_v58 = vsel %vm4275_vm2, %v2067_v56, %v4518_v2 }
 0x383   : > { %2073 = vst [vmem:[%s2072_s18] sm:$0xff] %v2071_v57 }
 0x384   : > { %3511 = shalt.err (!%p3508_p6)
}
 0x385   : > { %s3674_s17 = smov 128   ;;  %s4731_s18 = sld [smem:[#allocation25_spill]]  ;;  %2076 = vst [vmem:[#allocation2] sm:$0xff] %v2074_v58 }
 0x386   : > { %s3675_s1 = smov 256   ;;  %s3676_s2 = smov 8   ;;  %2078 = vst [vmem:[%s3984_s24] sm:$0xff] %v2074_v58 }
 0x387   : > { %3185 = dma.vmem_to_hbm [thread:$0]  (%p3912_p3), %s4544_s9, 512, %s4542_s30, %s2080_s16, %s3674_s17, %s3675_s1, %s3676_s2  }
 0x388   : > { %s2085_s11 = scalar_lea.sflag [#allocation13], %s3960_s5  ;;  %s3526_s6 = sshra.s32 %s4554_s4, 4  ;;  %s3527_s6 = int_to_ptr.hbm [resolvable:$true] %s3526_s6 }
 0x389   : > { %s3528_s0 = scalar_lea.hbm %s3527_s6, 8  ;;  %s3532_s12 = scalar_lea.hbm %s4730_s15, 16 }
 0x38a   : > { %p3529_p9 = scmp.ne.s32.totalorder %s3527_s6, %s3528_s0  ;;  %p3533_p8 = scmp.lt.s32.totalorder %s3527_s6, %s4730_s15 }
 0x38b   : > { %p4732_p5 = scmp.ne.s32.totalorder %s4731_s18, 0  ;;  %p3534_p7 = scmp.lt.s32.totalorder %s3532_s12, %s3528_s0 }
 0x38d   : > { %p3530_p12 = pnand %p3529_p9, %p4732_p5  ;;  %p3535_p3 = por %p3534_p7, %p3533_p8 }
 0x38f   : > { %p3531_p1 = pneg %p3530_p12 }
 0x391   : > { %p3536_p11 = pnand %p3535_p3, %p3531_p1 }
 0x393   : > { %3539 = shalt.err (!%p3536_p11)
}
 0x394   : > { %3186 = dma.vmem_to_hbm [thread:$0]  (%p4732_p5), %s4552_s7, 128, %s4554_s4, %s2085_s11  }
 0x395 PF: > { %p3207_p2 = scmp.ge.s32.totalorder %s3666_s10, 2  ;;  %s2135_s19 = sand.u32 1, %s3614_s21  }
 0x396   : > { %p4733_p13 = scmp.ne.s32.totalorder %s4707_s8, 0  ;;  %s2136_s5 = scalar_lea.sflag [#allocation7], %s2135_s19 }
 0x398   : > { %p3200_p0 = pnand %p3207_p2, %p4733_p13 }
 0x39a   : > { %p3201_p4 = pneg %p3200_p0 }
 0x39c   : > { %3605 = dma.done.wait (%p3201_p4), %s2136_s5, 512  }
 0x39d   : > { %3607 = vsyncadd (%p3201_p4), %s2136_s5, 4294966784  ;;  %s4734_s24 = sld [smem:[#allocation18_spill]] }
 0x39e   : > { %s4735_s3 = sld [smem:[#allocation26_spill]] }
 0x3a3   : > { %s2145_s30 = sand.u32 1, %s4734_s24  }
 0x3a4   : > { %p4736_p10 = scmp.ne.s32.totalorder %s4735_s3, 0  ;;  %s2146_s9 = scalar_lea.sflag [#allocation13], %s2145_s30 }
 0x3a6   : > { %p3203_p6 = pnand %p3207_p2, %p4736_p10 }
 0x3a8   : > { %p3204_p9 = pneg %p3203_p6 }
 0x3aa   : > { %3609 = dma.done.wait (%p3204_p9), %s2146_s9, 128  }
 0x3ab   : > { %3611 = vsyncadd (%p3204_p9), %s2146_s9, 4294967168  ;;  %s29_s10 = sadd.s32 1, %s3666_s10   ;;  %s4738_s24 = sld [smem:[#allocation19_spill]] }
 0x3ac   : > { %p4594_p5 = scmp.ge.s32.totalorder %s29_s10, 6   ;;  %s4739_s8 = sld [smem:[#allocation31_spill]] }
 0x3ad   : > { %s4740_s30 = sld [smem:[#allocation22_spill]]  ;;  %s4745_s21 = smov %s3618_s22 }
 0x3ae   : > { %s4741_s4 = sld [smem:[#allocation23_spill]]  ;;  %s4746_s22 = smov %s3622_s23 }
 0x3af   : > { %s4742_s16 = sld [smem:[#allocation29_spill]]  ;;  %s4747_s23 = smov %s3908_s27 }
 0x3b0   : > { %s4743_s9 = sld [smem:[#allocation30_spill]]  ;;  %s4748_s25 = smov %s3634_s26 }
 0x3b1   : > { %s4749_s26 = smov %s3897_s20  ;;  %s4750_s27 = smov %s3642_s28 }
 0x3b2   : > { %s4751_s28 = smov %s3646_s29  ;;  %s4752_s29 = smov %s4739_s8 }
 0x3b3   :  { %28 = sbr.rel (!%p4594_p5) target bundleno = 22 (0x16), region = 141 }
 0x3b4   : > { %s4753_s7 = smov %s4741_s4 }
 0x3b5   : > { %s4754_s8 = smov %s4742_s16 }
 0x3b8   :  { %2152 = vsyncpa [#allocation6], 1 }
 0x3b9   :  { %2154 = vsyncpa [#allocation6 + $0x1], 1 }
 0x3ba   :  { %2155 = vsyncpa [#allocation9], 1 }
 0x3bb   :  { %2157 = vsyncpa [#allocation9 + $0x1], 1 }
 0x3bc   :  { %2158 = vsyncpa [#allocation7], 1 }
 0x3bd   :  { %2160 = vsyncpa [#allocation7 + $0x1], 1 }
 0x3be   :  { %2161 = vsyncpa [#allocation13], 1 }
 0x3bf   :  { %2163 = vsyncpa [#allocation13 + $0x1], 1 }

</bundles_post_ra>
